<compile_context>
chip_gen: v7x
topology: tpu7x:2x2x1
jax: 0.10.0
libtpu: 0.0.40
codegen_flags: <defaults>
</compile_context>

<pallas_src>
import jax
import jax.numpy as jnp
import numpy as np
from jax.experimental import pallas as pl
from jax.experimental.pallas import tpu as pltpu


def _round_up(x, m):
    return (x + m - 1) // m * m


# ---------------------------- Pallas kernel ----------------------------

def _rpe_kernel(x_ref, w_ref, bias_ref, o_ref, xp_ref):
    # x_ref:    (1, H, W, Ct)   unpadded NHWC input block (also the residual)
    # w_ref:    (9, Ct)         depthwise 3x3 weights * BN scale, tap t = ky*3+kx
    # bias_ref: (1, Ct)         folded shift = (conv_b - mean)*scale + beta
    # o_ref:    (1, H, W, Ct)   x + BN(dwconv(x))
    # xp_ref:   (H+2, Wp, Ct)   VMEM scratch holding the zero-padded block,
    #                           Wp = round_up(W+2, 8) keeps sublanes aligned.
    H, W, C = o_ref.shape[1], o_ref.shape[2], o_ref.shape[3]

    # Build the zero halo in VMEM; the padded tensor never touches HBM.
    # (Zero-fill + interior copy is VMEM-only traffic, negligible next to the
    #  removed HBM pad read/write pass.)
    xp_ref[...] = jnp.zeros_like(xp_ref)
    xp_ref[pl.ds(1, H), pl.ds(1, W), :] = x_ref[0].astype(xp_ref.dtype)

    # Row band size: 8 output rows keeps (acc + one tap) well inside the vreg
    # file; fall back gracefully when H is not divisible by 8.
    if H % 8 == 0:
        band = 8
    elif H % 4 == 0:
        band = 4
    else:
        band = H

    for r in range(0, H, band):          # static unroll over row bands
        # Init with residual + folded BN shift, then add the 9 scaled taps.
        acc = x_ref[0, pl.ds(r, band), :, :].astype(jnp.float32) + bias_ref[0, :]
        for t in range(9):               # static unroll: 9 shifted taps (VPU FMAs)
            ky, kx = t // 3, t % 3
            tap = xp_ref[pl.ds(r + ky, band), pl.ds(kx, W), :]
            acc = acc + tap.astype(jnp.float32) * w_ref[t, :]
        o_ref[0, pl.ds(r, band), :, :] = acc.astype(o_ref.dtype)


# ---------------------------- wrappers ----------------------------

def rpe_forward_nhwc(x, params, eps=1e-5):
    """RPE.forward on an NHWC tensor (the preferred, transpose-free path).

    x: (B, H, W, C).  Returns x + BatchNorm2d(DepthwiseConv3x3(x)) in the
    same layout and dtype (BN in inference mode, stats folded).
    """
    B, H, W, C = x.shape

    # torch depthwise weight (C, 1, 3, 3) -> (9, C), tap t = ky*3 + kx,
    # with the eval-mode BN scale folded in; bias folds conv bias + BN shift.
    scale = params['gamma'] / jnp.sqrt(params['var'] + eps)
    wk = jnp.transpose(params['w'].reshape(C, 9), (1, 0)) * scale[None, :]
    bias = (params['b'] - params['mean']) * scale + params['beta']
    wk = wk.astype(jnp.float32)
    bias = bias.reshape(1, C).astype(jnp.float32)

    # Channel tiles: lane-dense 128-wide when possible, else the full C dim.
    c_tile = 128 if C % 128 == 0 else C
    n_ct = C // c_tile

    # Sublane-aligned width of the in-VMEM halo buffer.
    w_pad = _round_up(W + 2, 8)

    out = pl.pallas_call(
        _rpe_kernel,
        out_shape=jax.ShapeDtypeStruct((B, H, W, C), x.dtype),
        grid=(B, n_ct),
        in_specs=[
            pl.BlockSpec((1, H, W, c_tile), lambda b, c: (b, 0, 0, c)),
            pl.BlockSpec((9, c_tile), lambda b, c: (0, c)),
            pl.BlockSpec((1, c_tile), lambda b, c: (0, c)),
        ],
        out_specs=pl.BlockSpec((1, H, W, c_tile), lambda b, c: (b, 0, 0, c)),
        scratch_shapes=[pltpu.VMEM((H + 2, w_pad, c_tile), x.dtype)],
        compiler_params=pltpu.CompilerParams(
            dimension_semantics=("parallel", "parallel")),
    )(x, wk, bias)
    return out


def rpe_forward_nchw(x_nchw, params, eps=1e-5):
    """PyTorch-layout (NCHW) compatibility wrapper.

    Adds two layout transposes around the NHWC kernel; prefer
    `rpe_forward_nhwc` when the surrounding model already runs NHWC.
    """
    x = jnp.transpose(x_nchw, (0, 2, 3, 1))
    out = rpe_forward_nhwc(x, params, eps)
    return jnp.transpose(out, (0, 3, 1, 2))


# ---------------------------- pure-JAX reference ----------------------------

def _reference(x, params, eps=1e-5):
    """NCHW reference: x + BN(Conv2d(dim, dim, 3, pad=1, groups=dim)(x))."""
    C = x.shape[1]
    y = jax.lax.conv_general_dilated(
        x, params['w'], (1, 1), ((1, 1), (1, 1)),
        dimension_numbers=('NCHW', 'OIHW', 'NCHW'),
        feature_group_count=C)
    y = y + params['b'].reshape(1, -1, 1, 1)
    scale = (params['gamma'] / jnp.sqrt(params['var'] + eps)).reshape(1, -1, 1, 1)
    y = (y - params['mean'].reshape(1, -1, 1, 1)) * scale + params['beta'].reshape(1, -1, 1, 1)
    return x + y


def _make_params(key, dim):
    ks = jax.random.split(key, 6)
    return {
        'w': 0.2 * jax.random.normal(ks[0], (dim, 1, 3, 3), jnp.float32),
        'b': 0.1 * jax.random.normal(ks[1], (dim,), jnp.float32),
        'gamma': 1.0 + 0.1 * jax.random.normal(ks[2], (dim,), jnp.float32),
        'beta': 0.1 * jax.random.normal(ks[3], (dim,), jnp.float32),
        'mean': 0.1 * jax.random.normal(ks[4], (dim,), jnp.float32),
        'var': jnp.abs(jax.random.normal(ks[5], (dim,), jnp.float32)) + 0.5,
    }


# ---------------------------- main ----------------------------

if __name__ == "__main__":
    key = jax.random.PRNGKey(0)
    k_lane, k_small, kx1, kx2 = jax.random.split(key, 4)

    # 1) Lane-dense NHWC fast path: dim = 128 channels fill the 128 lanes.
    B, dim, H, W = 2, 128, 16, 16
    x1_nchw = jax.random.normal(kx1, (B, dim, H, W), jnp.float32)
    p1 = _make_params(k_lane, dim)
    x1_nhwc = jnp.transpose(x1_nchw, (0, 2, 3, 1))      # test-only layout prep
    out1 = jax.block_until_ready(rpe_forward_nhwc(x1_nhwc, p1))
    ref1 = jnp.transpose(_reference(x1_nchw, p1), (0, 2, 3, 1))
    np.testing.assert_allclose(np.asarray(out1), np.asarray(ref1),
                               rtol=1e-4, atol=1e-4)

    # 2) Small-channel case through the PyTorch-layout wrapper: x (2, 4, 16, 16).
    dim2 = 4
    x2 = jax.random.normal(kx2, (B, dim2, H, W), jnp.float32)
    p2 = _make_params(k_small, dim2)
    out2 = jax.block_until_ready(rpe_forward_nchw(x2, p2))
    ref2 = _reference(x2, p2)
    np.testing.assert_allclose(np.asarray(out2), np.asarray(ref2),
                               rtol=1e-4, atol=1e-4)

    print("KERNEL_OK")
</pallas_src>

<mosaic_0001>
module attributes {stable_mosaic.version = 11 : i64} {
  func.func @_rpe_kernel(%arg0: i32, %arg1: i32, %arg2: memref<1x16x16x128xf32, #tpu.memory_space<vmem>>, %arg3: memref<9x128xf32, #tpu.memory_space<vmem>>, %arg4: memref<1x128xf32, #tpu.memory_space<vmem>>, %arg5: memref<1x16x16x128xf32, #tpu.memory_space<vmem>>, %arg6: memref<18x24x128xf32, #tpu.memory_space<vmem>>) attributes {dimension_semantics = [#tpu.dimension_semantics<parallel>, #tpu.dimension_semantics<parallel>], iteration_bounds = array<i64: 2, 1>, scalar_prefetch = 0 : i64, scratch_operands = 1 : i64, tpu.core_type = #tpu.core_type<tc>, window_params = [{transform_indices = @transform_0, window_bounds = array<i64: 1, 16, 16, 128>}, {transform_indices = @transform_1, window_bounds = array<i64: 9, 128>}, {transform_indices = @transform_2, window_bounds = array<i64: 1, 128>}, {transform_indices = @transform_3, window_bounds = array<i64: 1, 16, 16, 128>}]} {
    %cst = arith.constant 0.000000e+00 : f32
    %0 = vector.broadcast %cst : f32 to vector<18x24x128xf32>
    %c0 = arith.constant 0 : index
    %c0_0 = arith.constant 0 : index
    %c0_1 = arith.constant 0 : index
    %1 = vector.load %arg6[%c0, %c0_0, %c0_1] : memref<18x24x128xf32, #tpu.memory_space<vmem>>, vector<18x24x128xf32>
    tpu.vector_store %arg6[%c0, %c0_0, %c0_1], %0 {strides = array<i32>} : memref<18x24x128xf32, #tpu.memory_space<vmem>>, vector<18x24x128xf32>,
    %c0_2 = arith.constant 0 : index
    %c0_3 = arith.constant 0 : index
    %c0_4 = arith.constant 0 : index
    %c0_5 = arith.constant 0 : index
    %2 = vector.load %arg2[%c0_2, %c0_3, %c0_4, %c0_5] : memref<1x16x16x128xf32, #tpu.memory_space<vmem>>, vector<1x16x16x128xf32>
    %3 = vector.shape_cast %2 : vector<1x16x16x128xf32> to vector<16x16x128xf32>
    %c1 = arith.constant 1 : index
    %c1_6 = arith.constant 1 : index
    %c0_7 = arith.constant 0 : index
    %4 = vector.load %arg6[%c1, %c1_6, %c0_7] : memref<18x24x128xf32, #tpu.memory_space<vmem>>, vector<16x16x128xf32>
    tpu.vector_store %arg6[%c1, %c1_6, %c0_7], %3 {strides = array<i32>} : memref<18x24x128xf32, #tpu.memory_space<vmem>>, vector<16x16x128xf32>,
    %c0_8 = arith.constant 0 : index
    %c0_9 = arith.constant 0 : index
    %c0_10 = arith.constant 0 : index
    %c0_11 = arith.constant 0 : index
    %5 = vector.load %arg2[%c0_8, %c0_9, %c0_10, %c0_11] : memref<1x16x16x128xf32, #tpu.memory_space<vmem>>, vector<1x8x16x128xf32>
    %6 = vector.shape_cast %5 : vector<1x8x16x128xf32> to vector<8x16x128xf32>
    %c0_12 = arith.constant 0 : index
    %c0_13 = arith.constant 0 : index
    %7 = vector.load %arg4[%c0_12, %c0_13] : memref<1x128xf32, #tpu.memory_space<vmem>>, vector<1x128xf32>
    %8 = vector.shape_cast %7 : vector<1x128xf32> to vector<128xf32>
    %9 = vector.shape_cast %8 : vector<128xf32> to vector<1x1x128xf32>
    %10 = vector.broadcast %9 : vector<1x1x128xf32> to vector<8x16x128xf32>
    %11 = arith.addf %6, %10 : vector<8x16x128xf32>
    %c0_14 = arith.constant 0 : index
    %c0_15 = arith.constant 0 : index
    %c0_16 = arith.constant 0 : index
    %12 = vector.load %arg6[%c0_14, %c0_15, %c0_16] : memref<18x24x128xf32, #tpu.memory_space<vmem>>, vector<8x16x128xf32>
    %c0_17 = arith.constant 0 : index
    %c0_18 = arith.constant 0 : index
    %13 = vector.load %arg3[%c0_17, %c0_18] : memref<9x128xf32, #tpu.memory_space<vmem>>, vector<1x128xf32>
    %14 = vector.shape_cast %13 : vector<1x128xf32> to vector<128xf32>
    %15 = vector.shape_cast %14 : vector<128xf32> to vector<1x1x128xf32>
    %16 = vector.broadcast %15 : vector<1x1x128xf32> to vector<8x16x128xf32>
    %17 = arith.mulf %12, %16 : vector<8x16x128xf32>
    %18 = arith.addf %11, %17 : vector<8x16x128xf32>
    %c0_19 = arith.constant 0 : index
    %c1_20 = arith.constant 1 : index
    %c0_21 = arith.constant 0 : index
    %19 = vector.load %arg6[%c0_19, %c1_20, %c0_21] : memref<18x24x128xf32, #tpu.memory_space<vmem>>, vector<8x16x128xf32>
    %c1_22 = arith.constant 1 : index
    %c0_23 = arith.constant 0 : index
    %20 = vector.load %arg3[%c1_22, %c0_23] : memref<9x128xf32, #tpu.memory_space<vmem>>, vector<1x128xf32>
    %21 = vector.shape_cast %20 : vector<1x128xf32> to vector<128xf32>
    %22 = vector.shape_cast %21 : vector<128xf32> to vector<1x1x128xf32>
    %23 = vector.broadcast %22 : vector<1x1x128xf32> to vector<8x16x128xf32>
    %24 = arith.mulf %19, %23 : vector<8x16x128xf32>
    %25 = arith.addf %18, %24 : vector<8x16x128xf32>
    %c0_24 = arith.constant 0 : index
    %c2 = arith.constant 2 : index
    %c0_25 = arith.constant 0 : index
    %26 = vector.load %arg6[%c0_24, %c2, %c0_25] : memref<18x24x128xf32, #tpu.memory_space<vmem>>, vector<8x16x128xf32>
    %c2_26 = arith.constant 2 : index
    %c0_27 = arith.constant 0 : index
    %27 = vector.load %arg3[%c2_26, %c0_27] : memref<9x128xf32, #tpu.memory_space<vmem>>, vector<1x128xf32>
    %28 = vector.shape_cast %27 : vector<1x128xf32> to vector<128xf32>
    %29 = vector.shape_cast %28 : vector<128xf32> to vector<1x1x128xf32>
    %30 = vector.broadcast %29 : vector<1x1x128xf32> to vector<8x16x128xf32>
    %31 = arith.mulf %26, %30 : vector<8x16x128xf32>
    %32 = arith.addf %25, %31 : vector<8x16x128xf32>
    %c1_28 = arith.constant 1 : index
    %c0_29 = arith.constant 0 : index
    %c0_30 = arith.constant 0 : index
    %33 = vector.load %arg6[%c1_28, %c0_29, %c0_30] : memref<18x24x128xf32, #tpu.memory_space<vmem>>, vector<8x16x128xf32>
    %c3 = arith.constant 3 : index
    %c0_31 = arith.constant 0 : index
    %34 = vector.load %arg3[%c3, %c0_31] : memref<9x128xf32, #tpu.memory_space<vmem>>, vector<1x128xf32>
    %35 = vector.shape_cast %34 : vector<1x128xf32> to vector<128xf32>
    %36 = vector.shape_cast %35 : vector<128xf32> to vector<1x1x128xf32>
    %37 = vector.broadcast %36 : vector<1x1x128xf32> to vector<8x16x128xf32>
    %38 = arith.mulf %33, %37 : vector<8x16x128xf32>
    %39 = arith.addf %32, %38 : vector<8x16x128xf32>
    %c1_32 = arith.constant 1 : index
    %c1_33 = arith.constant 1 : index
    %c0_34 = arith.constant 0 : index
    %40 = vector.load %arg6[%c1_32, %c1_33, %c0_34] : memref<18x24x128xf32, #tpu.memory_space<vmem>>, vector<8x16x128xf32>
    %c4 = arith.constant 4 : index
    %c0_35 = arith.constant 0 : index
    %41 = vector.load %arg3[%c4, %c0_35] : memref<9x128xf32, #tpu.memory_space<vmem>>, vector<1x128xf32>
    %42 = vector.shape_cast %41 : vector<1x128xf32> to vector<128xf32>
    %43 = vector.shape_cast %42 : vector<128xf32> to vector<1x1x128xf32>
    %44 = vector.broadcast %43 : vector<1x1x128xf32> to vector<8x16x128xf32>
    %45 = arith.mulf %40, %44 : vector<8x16x128xf32>
    %46 = arith.addf %39, %45 : vector<8x16x128xf32>
    %c1_36 = arith.constant 1 : index
    %c2_37 = arith.constant 2 : index
    %c0_38 = arith.constant 0 : index
    %47 = vector.load %arg6[%c1_36, %c2_37, %c0_38] : memref<18x24x128xf32, #tpu.memory_space<vmem>>, vector<8x16x128xf32>
    %c5 = arith.constant 5 : index
    %c0_39 = arith.constant 0 : index
    %48 = vector.load %arg3[%c5, %c0_39] : memref<9x128xf32, #tpu.memory_space<vmem>>, vector<1x128xf32>
    %49 = vector.shape_cast %48 : vector<1x128xf32> to vector<128xf32>
    %50 = vector.shape_cast %49 : vector<128xf32> to vector<1x1x128xf32>
    %51 = vector.broadcast %50 : vector<1x1x128xf32> to vector<8x16x128xf32>
    %52 = arith.mulf %47, %51 : vector<8x16x128xf32>
    %53 = arith.addf %46, %52 : vector<8x16x128xf32>
    %c2_40 = arith.constant 2 : index
    %c0_41 = arith.constant 0 : index
    %c0_42 = arith.constant 0 : index
    %54 = vector.load %arg6[%c2_40, %c0_41, %c0_42] : memref<18x24x128xf32, #tpu.memory_space<vmem>>, vector<8x16x128xf32>
    %c6 = arith.constant 6 : index
    %c0_43 = arith.constant 0 : index
    %55 = vector.load %arg3[%c6, %c0_43] : memref<9x128xf32, #tpu.memory_space<vmem>>, vector<1x128xf32>
    %56 = vector.shape_cast %55 : vector<1x128xf32> to vector<128xf32>
    %57 = vector.shape_cast %56 : vector<128xf32> to vector<1x1x128xf32>
    %58 = vector.broadcast %57 : vector<1x1x128xf32> to vector<8x16x128xf32>
    %59 = arith.mulf %54, %58 : vector<8x16x128xf32>
    %60 = arith.addf %53, %59 : vector<8x16x128xf32>
    %c2_44 = arith.constant 2 : index
    %c1_45 = arith.constant 1 : index
    %c0_46 = arith.constant 0 : index
    %61 = vector.load %arg6[%c2_44, %c1_45, %c0_46] : memref<18x24x128xf32, #tpu.memory_space<vmem>>, vector<8x16x128xf32>
    %c7 = arith.constant 7 : index
    %c0_47 = arith.constant 0 : index
    %62 = vector.load %arg3[%c7, %c0_47] : memref<9x128xf32, #tpu.memory_space<vmem>>, vector<1x128xf32>
    %63 = vector.shape_cast %62 : vector<1x128xf32> to vector<128xf32>
    %64 = vector.shape_cast %63 : vector<128xf32> to vector<1x1x128xf32>
    %65 = vector.broadcast %64 : vector<1x1x128xf32> to vector<8x16x128xf32>
    %66 = arith.mulf %61, %65 : vector<8x16x128xf32>
    %67 = arith.addf %60, %66 : vector<8x16x128xf32>
    %c2_48 = arith.constant 2 : index
    %c2_49 = arith.constant 2 : index
    %c0_50 = arith.constant 0 : index
    %68 = vector.load %arg6[%c2_48, %c2_49, %c0_50] : memref<18x24x128xf32, #tpu.memory_space<vmem>>, vector<8x16x128xf32>
    %c8 = arith.constant 8 : index
    %c0_51 = arith.constant 0 : index
    %69 = vector.load %arg3[%c8, %c0_51] : memref<9x128xf32, #tpu.memory_space<vmem>>, vector<1x128xf32>
    %70 = vector.shape_cast %69 : vector<1x128xf32> to vector<128xf32>
    %71 = vector.shape_cast %70 : vector<128xf32> to vector<1x1x128xf32>
    %72 = vector.broadcast %71 : vector<1x1x128xf32> to vector<8x16x128xf32>
    %73 = arith.mulf %68, %72 : vector<8x16x128xf32>
    %74 = arith.addf %67, %73 : vector<8x16x128xf32>
    %c0_52 = arith.constant 0 : index
    %c0_53 = arith.constant 0 : index
    %c0_54 = arith.constant 0 : index
    %c0_55 = arith.constant 0 : index
    %75 = vector.load %arg5[%c0_52, %c0_53, %c0_54, %c0_55] : memref<1x16x16x128xf32, #tpu.memory_space<vmem>>, vector<1x8x16x128xf32>
    %76 = vector.shape_cast %75 : vector<1x8x16x128xf32> to vector<8x16x128xf32>
    %77 = vector.shape_cast %74 : vector<8x16x128xf32> to vector<1x8x16x128xf32>
    tpu.vector_store %arg5[%c0_52, %c0_53, %c0_54, %c0_55], %77 {strides = array<i32>} : memref<1x16x16x128xf32, #tpu.memory_space<vmem>>, vector<1x8x16x128xf32>,
    %c0_56 = arith.constant 0 : index
    %c8_57 = arith.constant 8 : index
    %c0_58 = arith.constant 0 : index
    %c0_59 = arith.constant 0 : index
    %78 = vector.load %arg2[%c0_56, %c8_57, %c0_58, %c0_59] : memref<1x16x16x128xf32, #tpu.memory_space<vmem>>, vector<1x8x16x128xf32>
    %79 = vector.shape_cast %78 : vector<1x8x16x128xf32> to vector<8x16x128xf32>
    %c0_60 = arith.constant 0 : index
    %c0_61 = arith.constant 0 : index
    %80 = vector.load %arg4[%c0_60, %c0_61] : memref<1x128xf32, #tpu.memory_space<vmem>>, vector<1x128xf32>
    %81 = vector.shape_cast %80 : vector<1x128xf32> to vector<128xf32>
    %82 = vector.shape_cast %81 : vector<128xf32> to vector<1x1x128xf32>
    %83 = vector.broadcast %82 : vector<1x1x128xf32> to vector<8x16x128xf32>
    %84 = arith.addf %79, %83 : vector<8x16x128xf32>
    %c8_62 = arith.constant 8 : index
    %c0_63 = arith.constant 0 : index
    %c0_64 = arith.constant 0 : index
    %85 = vector.load %arg6[%c8_62, %c0_63, %c0_64] : memref<18x24x128xf32, #tpu.memory_space<vmem>>, vector<8x16x128xf32>
    %c0_65 = arith.constant 0 : index
    %c0_66 = arith.constant 0 : index
    %86 = vector.load %arg3[%c0_65, %c0_66] : memref<9x128xf32, #tpu.memory_space<vmem>>, vector<1x128xf32>
    %87 = vector.shape_cast %86 : vector<1x128xf32> to vector<128xf32>
    %88 = vector.shape_cast %87 : vector<128xf32> to vector<1x1x128xf32>
    %89 = vector.broadcast %88 : vector<1x1x128xf32> to vector<8x16x128xf32>
    %90 = arith.mulf %85, %89 : vector<8x16x128xf32>
    %91 = arith.addf %84, %90 : vector<8x16x128xf32>
    %c8_67 = arith.constant 8 : index
    %c1_68 = arith.constant 1 : index
    %c0_69 = arith.constant 0 : index
    %92 = vector.load %arg6[%c8_67, %c1_68, %c0_69] : memref<18x24x128xf32, #tpu.memory_space<vmem>>, vector<8x16x128xf32>
    %c1_70 = arith.constant 1 : index
    %c0_71 = arith.constant 0 : index
    %93 = vector.load %arg3[%c1_70, %c0_71] : memref<9x128xf32, #tpu.memory_space<vmem>>, vector<1x128xf32>
    %94 = vector.shape_cast %93 : vector<1x128xf32> to vector<128xf32>
    %95 = vector.shape_cast %94 : vector<128xf32> to vector<1x1x128xf32>
    %96 = vector.broadcast %95 : vector<1x1x128xf32> to vector<8x16x128xf32>
    %97 = arith.mulf %92, %96 : vector<8x16x128xf32>
    %98 = arith.addf %91, %97 : vector<8x16x128xf32>
    %c8_72 = arith.constant 8 : index
    %c2_73 = arith.constant 2 : index
    %c0_74 = arith.constant 0 : index
    %99 = vector.load %arg6[%c8_72, %c2_73, %c0_74] : memref<18x24x128xf32, #tpu.memory_space<vmem>>, vector<8x16x128xf32>
    %c2_75 = arith.constant 2 : index
    %c0_76 = arith.constant 0 : index
    %100 = vector.load %arg3[%c2_75, %c0_76] : memref<9x128xf32, #tpu.memory_space<vmem>>, vector<1x128xf32>
    %101 = vector.shape_cast %100 : vector<1x128xf32> to vector<128xf32>
    %102 = vector.shape_cast %101 : vector<128xf32> to vector<1x1x128xf32>
    %103 = vector.broadcast %102 : vector<1x1x128xf32> to vector<8x16x128xf32>
    %104 = arith.mulf %99, %103 : vector<8x16x128xf32>
    %105 = arith.addf %98, %104 : vector<8x16x128xf32>
    %c9 = arith.constant 9 : index
    %c0_77 = arith.constant 0 : index
    %c0_78 = arith.constant 0 : index
    %106 = vector.load %arg6[%c9, %c0_77, %c0_78] : memref<18x24x128xf32, #tpu.memory_space<vmem>>, vector<8x16x128xf32>
    %c3_79 = arith.constant 3 : index
    %c0_80 = arith.constant 0 : index
    %107 = vector.load %arg3[%c3_79, %c0_80] : memref<9x128xf32, #tpu.memory_space<vmem>>, vector<1x128xf32>
    %108 = vector.shape_cast %107 : vector<1x128xf32> to vector<128xf32>
    %109 = vector.shape_cast %108 : vector<128xf32> to vector<1x1x128xf32>
    %110 = vector.broadcast %109 : vector<1x1x128xf32> to vector<8x16x128xf32>
    %111 = arith.mulf %106, %110 : vector<8x16x128xf32>
    %112 = arith.addf %105, %111 : vector<8x16x128xf32>
    %c9_81 = arith.constant 9 : index
    %c1_82 = arith.constant 1 : index
    %c0_83 = arith.constant 0 : index
    %113 = vector.load %arg6[%c9_81, %c1_82, %c0_83] : memref<18x24x128xf32, #tpu.memory_space<vmem>>, vector<8x16x128xf32>
    %c4_84 = arith.constant 4 : index
    %c0_85 = arith.constant 0 : index
    %114 = vector.load %arg3[%c4_84, %c0_85] : memref<9x128xf32, #tpu.memory_space<vmem>>, vector<1x128xf32>
    %115 = vector.shape_cast %114 : vector<1x128xf32> to vector<128xf32>
    %116 = vector.shape_cast %115 : vector<128xf32> to vector<1x1x128xf32>
    %117 = vector.broadcast %116 : vector<1x1x128xf32> to vector<8x16x128xf32>
    %118 = arith.mulf %113, %117 : vector<8x16x128xf32>
    %119 = arith.addf %112, %118 : vector<8x16x128xf32>
    %c9_86 = arith.constant 9 : index
    %c2_87 = arith.constant 2 : index
    %c0_88 = arith.constant 0 : index
    %120 = vector.load %arg6[%c9_86, %c2_87, %c0_88] : memref<18x24x128xf32, #tpu.memory_space<vmem>>, vector<8x16x128xf32>
    %c5_89 = arith.constant 5 : index
    %c0_90 = arith.constant 0 : index
    %121 = vector.load %arg3[%c5_89, %c0_90] : memref<9x128xf32, #tpu.memory_space<vmem>>, vector<1x128xf32>
    %122 = vector.shape_cast %121 : vector<1x128xf32> to vector<128xf32>
    %123 = vector.shape_cast %122 : vector<128xf32> to vector<1x1x128xf32>
    %124 = vector.broadcast %123 : vector<1x1x128xf32> to vector<8x16x128xf32>
    %125 = arith.mulf %120, %124 : vector<8x16x128xf32>
    %126 = arith.addf %119, %125 : vector<8x16x128xf32>
    %c10 = arith.constant 10 : index
    %c0_91 = arith.constant 0 : index
    %c0_92 = arith.constant 0 : index
    %127 = vector.load %arg6[%c10, %c0_91, %c0_92] : memref<18x24x128xf32, #tpu.memory_space<vmem>>, vector<8x16x128xf32>
    %c6_93 = arith.constant 6 : index
    %c0_94 = arith.constant 0 : index
    %128 = vector.load %arg3[%c6_93, %c0_94] : memref<9x128xf32, #tpu.memory_space<vmem>>, vector<1x128xf32>
    %129 = vector.shape_cast %128 : vector<1x128xf32> to vector<128xf32>
    %130 = vector.shape_cast %129 : vector<128xf32> to vector<1x1x128xf32>
    %131 = vector.broadcast %130 : vector<1x1x128xf32> to vector<8x16x128xf32>
    %132 = arith.mulf %127, %131 : vector<8x16x128xf32>
    %133 = arith.addf %126, %132 : vector<8x16x128xf32>
    %c10_95 = arith.constant 10 : index
    %c1_96 = arith.constant 1 : index
    %c0_97 = arith.constant 0 : index
    %134 = vector.load %arg6[%c10_95, %c1_96, %c0_97] : memref<18x24x128xf32, #tpu.memory_space<vmem>>, vector<8x16x128xf32>
    %c7_98 = arith.constant 7 : index
    %c0_99 = arith.constant 0 : index
    %135 = vector.load %arg3[%c7_98, %c0_99] : memref<9x128xf32, #tpu.memory_space<vmem>>, vector<1x128xf32>
    %136 = vector.shape_cast %135 : vector<1x128xf32> to vector<128xf32>
    %137 = vector.shape_cast %136 : vector<128xf32> to vector<1x1x128xf32>
    %138 = vector.broadcast %137 : vector<1x1x128xf32> to vector<8x16x128xf32>
    %139 = arith.mulf %134, %138 : vector<8x16x128xf32>
    %140 = arith.addf %133, %139 : vector<8x16x128xf32>
    %c10_100 = arith.constant 10 : index
    %c2_101 = arith.constant 2 : index
    %c0_102 = arith.constant 0 : index
    %141 = vector.load %arg6[%c10_100, %c2_101, %c0_102] : memref<18x24x128xf32, #tpu.memory_space<vmem>>, vector<8x16x128xf32>
    %c8_103 = arith.constant 8 : index
    %c0_104 = arith.constant 0 : index
    %142 = vector.load %arg3[%c8_103, %c0_104] : memref<9x128xf32, #tpu.memory_space<vmem>>, vector<1x128xf32>
    %143 = vector.shape_cast %142 : vector<1x128xf32> to vector<128xf32>
    %144 = vector.shape_cast %143 : vector<128xf32> to vector<1x1x128xf32>
    %145 = vector.broadcast %144 : vector<1x1x128xf32> to vector<8x16x128xf32>
    %146 = arith.mulf %141, %145 : vector<8x16x128xf32>
    %147 = arith.addf %140, %146 : vector<8x16x128xf32>
    %c0_105 = arith.constant 0 : index
    %c8_106 = arith.constant 8 : index
    %c0_107 = arith.constant 0 : index
    %c0_108 = arith.constant 0 : index
    %148 = vector.load %arg5[%c0_105, %c8_106, %c0_107, %c0_108] : memref<1x16x16x128xf32, #tpu.memory_space<vmem>>, vector<1x8x16x128xf32>
    %149 = vector.shape_cast %148 : vector<1x8x16x128xf32> to vector<8x16x128xf32>
    %150 = vector.shape_cast %147 : vector<8x16x128xf32> to vector<1x8x16x128xf32>
    tpu.vector_store %arg5[%c0_105, %c8_106, %c0_107, %c0_108], %150 {strides = array<i32>} : memref<1x16x16x128xf32, #tpu.memory_space<vmem>>, vector<1x8x16x128xf32>,
    return
  }
  func.func @transform_0(%arg0: i32, %arg1: i32) -> (i32, i32, i32, i32) {
    %c0_i32 = arith.constant 0 : i32
    %c0_i32_0 = arith.constant 0 : i32
    %c0_i32_1 = arith.constant 0 : i32
    return %arg0, %c0_i32, %c0_i32_0, %arg1 : i32, i32, i32, i32
  }
  func.func @transform_1(%arg0: i32, %arg1: i32) -> (i32, i32) {
    %c0_i32 = arith.constant 0 : i32
    %c0_i32_0 = arith.constant 0 : i32
    return %c0_i32, %arg1 : i32, i32
  }
  func.func @transform_2(%arg0: i32, %arg1: i32) -> (i32, i32) {
    %c0_i32 = arith.constant 0 : i32
    %c0_i32_0 = arith.constant 0 : i32
    return %c0_i32, %arg1 : i32, i32
  }
  func.func @transform_3(%arg0: i32, %arg1: i32) -> (i32, i32, i32, i32) {
    %c0_i32 = arith.constant 0 : i32
    %c0_i32_0 = arith.constant 0 : i32
    %c0_i32_1 = arith.constant 0 : i32
    return %arg0, %c0_i32, %c0_i32_0, %arg1 : i32, i32, i32, i32
  }
}

</mosaic_0001>

<bundles_post_ra>
// kernel: tpu_custom_call.1
= control target key start
LH: loop header
LB: loop body
LE: loop exit
PB: predicated region body
PF: predicated region fallthrough
CT: control target
= control target key end

     0   :  { %8 = vsyncpa [#allocation4], 0  ;;  %s2905_s0 = inlined_call_operand.hbm [shape: f32[2,16,16,128], index: 0, kind: input, shape index: {}]   ;;  %s2906_s1 = inlined_call_operand.hbm [shape: f32[9,128], index: 1, kind: input, shape index: {}]   ;;  %s2907_s2 = inlined_call_operand.vmem [shape: f32[1,128], index: 2, kind: input, shape index: {}]   ;;  %s2908_s3 = inlined_call_operand.hbm [shape: f32[2,16,16,128], index: 3, kind: output, shape index: {}]  }
   0x1   :  { %10 = vsyncpa [#allocation4 + $0x1], 0 }
   0x2   :  { %11 = vsyncpa [#allocation7], 0 }
   0x3   :  { %12 = vsyncpa [#allocation5], 0 }
   0x4   :  { %14 = vsyncpa [#allocation5 + $0x1], 0  ;;  %s1890_s12 = smov 0   ;;  %s1892_s13 = smov 0  }
   0x5   :  { %s1894_s14 = smov 0   ;;  %s1896_s15 = smov 0  }
   0x6   :  { %s1898_s16 = smov 0   ;;  %s1900_s17 = smov 0  }
   0x7 LB: > { %s1555_s18 = sadd.s32 4294967295, %s1860_s17   ;;  %s1556_s19 = sadd.s32 4294967294, %s1860_s17   ;;  %s1860_s17 = sphi %s1900_s17, %s20_s17   ;;  %s1856_s16 = sphi %s1898_s16, %s2932_s16   ;;  %s1852_s15 = sphi %s1896_s15, %s2931_s15   ;;  %s1848_s14 = sphi %s1894_s14, %s2930_s14   ;;  %s1844_s13 = sphi %s1892_s13, %s2929_s13   ;;  %s1840_s12 = sphi %s1890_s12, %s2928_s12  }
   0x8   : > { %p54_p0 = scmp.ne.s32.totalorder %s1844_s13, %s1840_s12  ;;  %p1924_p1 = scmp.eq.s32.totalorder %s1555_s18, 0 }
   0x9   : > { %p1928_p2 = scmp.eq.s32.totalorder %s1555_s18, 1  ;;  %p138_p3 = scmp.eq.s32.totalorder %s1556_s19, 1 }
   0xa   : > { %s2913_s20 = scalar_select %p1924_p1, 1, 0 }
   0xb   : > { %s2914_s21 = scalar_select %p1928_p2, 1, 0 }
   0xc   : > { %p1934_p4 = por %p1924_p1, %p54_p0  ;;  %p1557_p5 = scmp.ge.s32.totalorder %s1860_s17, 1 }
   0xd   : > { %p1939_p6 = por %p138_p3, %p54_p0  ;;  %p145_p7 = scmp.lt.s32.totalorder %s1860_s17, 3 }
   0xe   : > { %s2915_s22 = scalar_select %p1934_p4, 1, 0 }
   0xf   : > { %s2916_s23 = scalar_select %p1939_p6, 1, 0 }
  0x10   : > { %p1944_p8 = pnand %p1557_p5, %p145_p7  ;;  %s1862_s25 = smov [#allocation6]  }
  0x11   : > { %s159_s26 = sshll.u32 %s1862_s25, 4  ;;  %s32_s28 = sadd.s32 1, %s1856_s16  ;;  %s160_s26 = int_to_ptr.vmem [resolvable:$true] %s159_s26 }
  0x12   : > { %s2917_s24 = scalar_select %p1944_p8, 1, 0 }
  0x13   : > { %p1635_p9 = pneg %p1944_p8  ;;  %s1716_s4 = scalar_lea.hbm %s2906_s1, 256 }
  0x14   : > { %p1717_p12 = scmp.ne.s32.totalorder %s2906_s1, %s1716_s4  ;;  %p1723_p5 = scmp.lt.u32.totalorder %s1716_s4, %s2906_s1 }
  0x15   : > { %p1953_p11 = pnand %p1635_p9, %p1924_p1 }
  0x17   : > { %p1718_p13 = pneg %p1953_p11 }
  0x19   : > { %p1719_p0 = pnand %p1718_p13, %p1717_p12 }
  0x1b   : > { %p1720_p3 = pneg %p1719_p0 }
  0x1d   : > { %p1725_p7 = pnand %p1723_p5, %p1720_p3 }
  0x1f   : > { %1728 = shalt.err (!%p1725_p7)
}
  0x20   : > { %s1729_s9 = scalar_lea.vmem %s160_s26, 256  ;;  %p1737_p1 = scmp.lt.s32.totalorder %s160_s26, %s160_s26 }
  0x21   : > { %p1730_p9 = scmp.ne.s32.totalorder %s160_s26, %s1729_s9  ;;  %p1738_p4 = scmp.lt.s32.totalorder %s1729_s9, %s1729_s9 }
  0x23   : > { %p1732_p10 = pnand %p1730_p9, %p1718_p13  ;;  %p1739_p8 = por %p1738_p4, %p1737_p1 }
  0x25   : > { %p1733_p6 = pneg %p1732_p10 }
  0x27   : > { %p1740_p2 = pnand %p1739_p8, %p1733_p6 }
  0x29   : > { %1743 = shalt.err (!%p1740_p2)
}
  0x2a   : > { %s1863_s10 = smov 128   ;;  %s1864_s11 = smov 8  }
  0x2b   : > { %1638 = dma.hbm_to_vmem [thread:$0]  (!%p1953_p11), %s2906_s1, 256, %s160_s26, [#allocation7], %s1863_s10, %s1863_s10, %s1864_s11  }
  0x2c   : > { %p34_p1 = scmp.ge.s32.totalorder %s32_s28, 2  ;;  %s41_s25 = sadd.s32 1, %s1848_s14 }
  0x2d   : > { %p48_p2 = scmp.ne.s32.totalorder %s1848_s14, %s1844_s13  ;;  %p49_p4 = scmp.eq.s32.totalorder %s1860_s17, 0 }
  0x2e   : > { %s2934_s28 = smov (%p34_p1, %s32_s28), 0  ;;  %p2920_p8 = scmp.ne.s32.totalorder %s2914_s21, 0 }
  0x2f   : > { %p1983_p6 = por %p49_p4, %p48_p2  ;;  %s36_s30 = ssub.s32 %s1856_s16, %s2934_s28 }
  0x30   : > { %p1989_p10 = por %p2920_p8, %p48_p2  ;;  %p1648_p12 = scmp.lt.s32.totalorder %s1860_s17, 2 }
  0x31   : > { %p39_p11 = scmp.eq.s32.totalorder %s36_s30, 0  ;;  %s179_s26 = sand.u32 1, %s1848_s14  }
  0x32   : > { %s1561_s4 = sshll.u32 %s179_s26, 8  ;;  %s1625_s6 = sshll.u32 %s1856_s16, 12 }
  0x33   : > { %s1998_s5 = scalar_select %p39_p11, %s1848_s14, %s41_s25  }
  0x34   : > { %s2004_s9 = scalar_lea.hbm %s2905_s0, %s1625_s6  ;;  %s183_s21 = scalar_lea.vmem [#allocation3], %s1561_s4 }
  0x35   : > { %s191_s18 = sshll.u32 %s183_s21, 4  ;;  %p2010_p13 = pnand %p1648_p12, %p1983_p6  ;;  %s2006_s18 = int_to_ptr.vmem [resolvable:$true] %s191_s18 }
  0x36   : > { %s2014_s25 = scalar_lea.sflag [#allocation4], %s179_s26  ;;  %s1744_s30 = scalar_lea.hbm %s2004_s9, 4096 }
  0x37   : > { %p1745_p0 = scmp.ne.s32.totalorder %s2004_s9, %s1744_s30  ;;  %p1746_p3 = pneg %p2010_p13 }
  0x38   : > { %s1749_s29 = scalar_lea.hbm %s2905_s0, 8192  ;;  %p1750_p9 = scmp.lt.u32.totalorder %s2004_s9, %s2905_s0 }
  0x39   : > { %p1747_p5 = pnand %p1746_p3, %p1745_p0  ;;  %p1751_p1 = scmp.lt.u32.totalorder %s1749_s29, %s1744_s30 }
  0x3a   : > { %p1753_p4 = scmp.lt.u32.totalorder %s1744_s30, %s2004_s9 }
  0x3b   : > { %p1748_p7 = pneg %p1747_p5  ;;  %p1752_p2 = por %p1751_p1, %p1750_p9 }
  0x3d   : > { %p1754_p6 = por %p1753_p4, %p1752_p2 }
  0x3f   : > { %p1755_p8 = pnand %p1754_p6, %p1748_p7 }
  0x41   : > { %1758 = shalt.err (!%p1755_p8)
}
  0x42   : > { %s1759_s26 = scalar_lea.vmem %s2006_s18, 4096  ;;  %s1865_s21 = smov [#allocation3]  }
  0x43   : > { %p1760_p12 = scmp.ne.s32.totalorder %s2006_s18, %s1759_s26  ;;  %s1764_s4 = sshll.u32 %s1865_s21, 4  ;;  %s1765_s4 = int_to_ptr.vmem [resolvable:$false] %s1764_s4 }
  0x44   : > { %s1766_s6 = scalar_lea.vmem %s1765_s4, 8192  ;;  %p1767_p5 = scmp.lt.s32.totalorder %s2006_s18, %s1765_s4 }
  0x45   : > { %p1762_p11 = pnand %p1760_p12, %p1746_p3  ;;  %p1768_p9 = scmp.lt.s32.totalorder %s1766_s6, %s1759_s26 }
  0x47   : > { %p1763_p0 = pneg %p1762_p11  ;;  %p1769_p1 = por %p1768_p9, %p1767_p5 }
  0x49   : > { %p1770_p2 = pnand %p1769_p1, %p1763_p0 }
  0x4b   : > { %1773 = shalt.err (!%p1770_p2)
}
  0x4c   : > { %1642 = dma.hbm_to_vmem [thread:$0]  (!%p2010_p13), %s2004_s9, 4096, %s2006_s18, %s2014_s25, %s1863_s10, %s1863_s10, %s1864_s11  }
  0x4d   : > { %p2923_p3 = scmp.ne.s32.totalorder %s2917_s24, 0 }
  0x4e   : > { %s2048_s30 = sand.u32 (!%p2923_p3), 1, %s1844_s13   ;;  %p2924_p7 = scmp.ne.s32.totalorder (!%p2923_p3), %s2915_s22, 0 }
  0x4f   : > { %203 = sbr.rel (%p2923_p3) target bundleno = 301 (0x12d), region = 32  ;;  %s1565_s29 = sshll.u32 (!%p2923_p3), %s2048_s30, 8 }
  0x50   : > { %s206_s7 = scalar_lea.sflag (!%p2923_p3), [#allocation4], %s2048_s30  ;;  %s2054_s19 = scalar_lea.vmem (!%p2923_p3), [#allocation3], %s1565_s29 }
  0x56   : > { %1827 = dma.done.wait (%p2924_p7), %s206_s7, 4096  }
  0x57   : > { %1829 = vsyncadd (%p2924_p7), %s206_s7, 4294963200  ;;  %p2925_p13 = scmp.ne.s32.totalorder %s2913_s20, 0 }
  0x59   : > { %1831 = dma.done.wait (%p2925_p13), [#allocation7], 256  }
  0x5a   : > { %1833 = vsyncadd (%p2925_p13), [#allocation7], 4294967040  ;;  %v1866_v0 = vmov 0.0   ;;  %v2065_v1 = vld [vmem:[%s2054_s19] sm:$0xff]  ;;  %v2068_v2 = vld [vmem:[%s2054_s19 + $0x8] sm:$0xff]  ;;  %s2246_s24 = scalar_lea.vmem [#allocation8], %s1565_s29 }
  0x5b   : > { %242 = vst [vmem:[#allocation2] sm:$0xff] %v1866_v0  ;;  %243 = vst [vmem:[#allocation2 + $0x8] sm:$0xff] %v1866_v0  ;;  %v2071_v3 = vld [vmem:[%s2054_s19 + $0x10] sm:$0xff]  ;;  %v2077_v4 = vld [vmem:[%s2054_s19 + $0x18] sm:$0xff]  ;;  %s1626_s9 = sshll.u32 %s1852_s15, 12  ;;  %s1446_s18 = sshll.u32 %s2246_s24, 4  ;;  %s2855_s18 = int_to_ptr.vmem [resolvable:$true] %s1446_s18 }
  0x5c   : > { %244 = vst [vmem:[#allocation2 + $0x10] sm:$0xff] %v1866_v0  ;;  %245 = vst [vmem:[#allocation2 + $0x18] sm:$0xff] %v1866_v0  ;;  %v2080_v5 = vld [vmem:[%s2054_s19 + $0x20] sm:$0xff]  ;;  %v2083_v6 = vld [vmem:[%s2054_s19 + $0x28] sm:$0xff]  ;;  %s2853_s26 = scalar_lea.hbm %s2908_s3, %s1626_s9  ;;  %s1432_s21 = scalar_lea.sflag [#allocation5], %s2048_s30 }
  0x5d   : > { %246 = vst [vmem:[#allocation2 + $0x20] sm:$0xff] %v1866_v0  ;;  %247 = vst [vmem:[#allocation2 + $0x28] sm:$0xff] %v1866_v0  ;;  %v2089_v7 = vld [vmem:[%s2054_s19 + $0x30] sm:$0xff]  ;;  %v2092_v8 = vld [vmem:[%s2054_s19 + $0x38] sm:$0xff]  ;;  %s1774_s4 = scalar_lea.vmem %s2855_s18, 4096  ;;  %s1867_s15 = smov [#allocation8]  }
  0x5e   : > { %248 = vst [vmem:[#allocation2 + $0x30] sm:$0xff] %v1866_v0  ;;  %249 = vst [vmem:[#allocation2 + $0x38] sm:$0xff] %v1866_v0  ;;  %v2095_v9 = vld [vmem:[%s2054_s19 + $0x40] sm:$0xff]  ;;  %v2101_v10 = vld [vmem:[%s2054_s19 + $0x48] sm:$0xff]  ;;  %p1775_p4 = scmp.ne.s32.totalorder %s2855_s18, %s1774_s4  ;;  %s1778_s6 = sshll.u32 %s1867_s15, 4  ;;  %s1779_s6 = int_to_ptr.vmem [resolvable:$false] %s1778_s6 }
  0x5f   : > { %250 = vst [vmem:[#allocation2 + $0x40] sm:$0xff] %v1866_v0  ;;  %251 = vst [vmem:[#allocation2 + $0x48] sm:$0xff] %v1866_v0  ;;  %v2104_v11 = vld [vmem:[%s2054_s19 + $0x50] sm:$0xff]  ;;  %v2107_v12 = vld [vmem:[%s2054_s19 + $0x58] sm:$0xff]  ;;  %s1780_s29 = scalar_lea.vmem %s1779_s6, 8192  ;;  %p1781_p12 = scmp.lt.s32.totalorder %s2855_s18, %s1779_s6 }
  0x60   : > { %252 = vst [vmem:[#allocation2 + $0x50] sm:$0xff] %v1866_v0  ;;  %253 = vst [vmem:[#allocation2 + $0x58] sm:$0xff] %v1866_v0  ;;  %v2113_v13 = vld [vmem:[%s2054_s19 + $0x60] sm:$0xff]  ;;  %v2116_v14 = vld [vmem:[%s2054_s19 + $0x68] sm:$0xff]  ;;  %p1776_p6 = pnand %p1775_p4, %p1989_p10  ;;  %p1782_p11 = scmp.lt.s32.totalorder %s1780_s29, %s1774_s4 }
  0x61   : > { %254 = vst [vmem:[#allocation2 + $0x60] sm:$0xff] %v1866_v0  ;;  %255 = vst [vmem:[#allocation2 + $0x68] sm:$0xff] %v1866_v0  ;;  %v2119_v15 = vld [vmem:[%s2054_s19 + $0x70] sm:$0xff]  ;;  %v2125_v16 = vld [vmem:[%s2054_s19 + $0x78] sm:$0xff] }
  0x62   : > { %256 = vst [vmem:[#allocation2 + $0x70] sm:$0xff] %v1866_v0  ;;  %257 = vst [vmem:[#allocation2 + $0x78] sm:$0xff] %v1866_v0  ;;  %v2128_v17 = vld [vmem:[%s2054_s19 + $0x80] sm:$0xff]  ;;  %v313_v18 = vld [vmem:[%s2054_s19 + $0x88] sm:$0xff]  ;;  %p1777_p8 = pneg %p1776_p6  ;;  %p1783_p0 = por %p1782_p11, %p1781_p12 }
  0x63   : > { %258 = vst [vmem:[#allocation2 + $0x80] sm:$0xff] %v1866_v0  ;;  %259 = vst [vmem:[#allocation2 + $0x88] sm:$0xff] %v1866_v0  ;;  %v314_v19 = vld [vmem:[%s2054_s19 + $0x90] sm:$0xff]  ;;  %v315_v20 = vld [vmem:[%s2054_s19 + $0x98] sm:$0xff] }
  0x64   : > { %260 = vst [vmem:[#allocation2 + $0x90] sm:$0xff] %v1866_v0  ;;  %261 = vst [vmem:[#allocation2 + $0x98] sm:$0xff] %v1866_v0  ;;  %v316_v21 = vld [vmem:[%s2054_s19 + $0xa0] sm:$0xff]  ;;  %v317_v22 = vld [vmem:[%s2054_s19 + $0xa8] sm:$0xff]  ;;  %p1784_p5 = pnand %p1783_p0, %p1777_p8 }
  0x65   : > { %262 = vst [vmem:[#allocation2 + $0xa0] sm:$0xff] %v1866_v0  ;;  %263 = vst [vmem:[#allocation2 + $0xa8] sm:$0xff] %v1866_v0  ;;  %v318_v23 = vld [vmem:[%s2054_s19 + $0xb0] sm:$0xff]  ;;  %v319_v24 = vld [vmem:[%s2054_s19 + $0xb8] sm:$0xff] }
  0x66   : > { %264 = vst [vmem:[#allocation2 + $0xb0] sm:$0xff] %v1866_v0  ;;  %265 = vst [vmem:[#allocation2 + $0xb8] sm:$0xff] %v1866_v0  ;;  %v320_v25 = vld [vmem:[%s2054_s19 + $0xc0] sm:$0xff]  ;;  %v321_v26 = vld [vmem:[%s2054_s19 + $0xc8] sm:$0xff] }
  0x67   : > { %266 = vst [vmem:[#allocation2 + $0xc0] sm:$0xff] %v1866_v0  ;;  %267 = vst [vmem:[#allocation2 + $0xc8] sm:$0xff] %v1866_v0  ;;  %v322_v27 = vld [vmem:[%s2054_s19 + $0xd0] sm:$0xff]  ;;  %v323_v28 = vld [vmem:[%s2054_s19 + $0xd8] sm:$0xff] }
  0x68   : > { %268 = vst [vmem:[#allocation2 + $0xd0] sm:$0xff] %v1866_v0  ;;  %269 = vst [vmem:[#allocation2 + $0xd8] sm:$0xff] %v1866_v0  ;;  %v324_v29 = vld [vmem:[%s2054_s19 + $0xe0] sm:$0xff]  ;;  %v325_v30 = vld [vmem:[%s2054_s19 + $0xe8] sm:$0xff] }
  0x69   : > { %270 = vst [vmem:[#allocation2 + $0xe0] sm:$0xff] %v1866_v0  ;;  %271 = vst [vmem:[#allocation2 + $0xe8] sm:$0xff] %v1866_v0  ;;  %v326_v31 = vld [vmem:[%s2054_s19 + $0xf0] sm:$0xff]  ;;  %v327_v32 = vld [vmem:[%s2054_s19 + $0xf8] sm:$0xff] }
  0x6a   : > { %272 = vst [vmem:[#allocation2 + $0xf0] sm:$0xff] %v1866_v0  ;;  %273 = vst [vmem:[#allocation2 + $0xf8] sm:$0xff] %v1866_v0  ;;  %v2150_v33 = vld [vmem:[%s2907_s2] ss:$0 sm:$0xff]  ;;  %v2154_v35 = vld [vmem:[#allocation6] ss:$0 sm:$0xff] }
  0x6b   : > { %274 = vst [vmem:[#allocation2 + $0x100] sm:$0xff] %v1866_v0  ;;  %275 = vst [vmem:[#allocation2 + $0x108] sm:$0xff] %v1866_v0  ;;  %v384_v34 = vadd.f32 %v2150_v33, %v2065_v1  ;;  %v453_v36 = vld [vmem:[#allocation2 + $0x1] sm:$0xff]  ;;  %v2156_v37 = vld [vmem:[#allocation6 + $0x1] ss:$0 sm:$0xff]  ;;  %v385_v38 = vadd.f32 %v2150_v33, %v2068_v2  ;;  %v386_v39 = vadd.f32 %v2150_v33, %v2071_v3  ;;  %v421_v40 = vmul.f32 0.0, %v2154_v35 }
  0x6c   : > { %276 = vst [vmem:[#allocation2 + $0x110] sm:$0xff] %v1866_v0  ;;  %277 = vst [vmem:[#allocation2 + $0x118] sm:$0xff] %v1866_v0  ;;  %v474_v41 = vmul.f32 %v2156_v37, %v453_v36  ;;  %v506_v42 = vld [vmem:[#allocation2 + $0x2] sm:$0xff]  ;;  %v2164_v43 = vld [vmem:[#allocation6 + $0x2] ss:$0 sm:$0xff]  ;;  %v476_v47 = vmul.f32 %v2156_v37, %v2065_v1  ;;  %v387_v57 = vadd.f32 %v2150_v33, %v2077_v4 }
  0x6d   : > { %278 = vst [vmem:[#allocation2 + $0x120] sm:$0xff] %v1866_v0  ;;  %279 = vst [vmem:[#allocation2 + $0x128] sm:$0xff] %v1866_v0  ;;  %v2166_v45 = vld [vmem:[#allocation6 + $0x3] ss:$0 sm:$0xff]  ;;  %v437_v48 = vadd.f32 %v421_v40, %v384_v34  ;;  %v527_v49 = vmul.f32 %v2164_v43, %v506_v42  ;;  %v2172_v50 = vld [vmem:[#allocation6 + $0x4] ss:$0 sm:$0xff]  ;;  %v438_v55 = vadd.f32 %v421_v40, %v385_v38 }
  0x6e   : > { %280 = vst [vmem:[#allocation2 + $0x130] sm:$0xff] %v1866_v0  ;;  %281 = vst [vmem:[#allocation2 + $0x138] sm:$0xff] %v1866_v0  ;;  %v2174_v52 = vld [vmem:[#allocation6 + $0x5] ss:$0 sm:$0xff]  ;;  %v2176_v54 = vld [vmem:[#allocation6 + $0x6] ss:$0 sm:$0xff]  ;;  %v477_v58 = vmul.f32 %v2156_v37, %v2068_v2 }
  0x6f   : > { %282 = vst [vmem:[#allocation2 + $0x140] sm:$0xff] %v1866_v0  ;;  %283 = vst [vmem:[#allocation2 + $0x148] sm:$0xff] %v1866_v0  ;;  %v490_v59 = vadd.f32 %v474_v41, %v437_v48  ;;  %v454_v61 = vld [vmem:[#allocation2 + $0x9] sm:$0xff] }
  0x70   : > { %284 = vst [vmem:[#allocation2 + $0x150] sm:$0xff] %v1866_v0  ;;  %285 = vst [vmem:[#allocation2 + $0x158] sm:$0xff] %v1866_v0  ;;  %v507_v62 = vld [vmem:[#allocation2 + $0xa] sm:$0xff] }
  0x71   : > { %286 = vst [vmem:[#allocation2 + $0x160] sm:$0xff] %v1866_v0  ;;  %287 = vst [vmem:[#allocation2 + $0x168] sm:$0xff] %v1866_v0 }
  0x72   : > { %288 = vst [vmem:[#allocation2 + $0x170] sm:$0xff] %v1866_v0  ;;  %289 = vst [vmem:[#allocation2 + $0x178] sm:$0xff] %v1866_v0 }
  0x73   : > { %290 = vst [vmem:[#allocation2 + $0x180] sm:$0xff] %v1866_v0  ;;  %291 = vst [vmem:[#allocation2 + $0x188] sm:$0xff] %v1866_v0 }
  0x74   : > { %292 = vst [vmem:[#allocation2 + $0x190] sm:$0xff] %v1866_v0  ;;  %293 = vst [vmem:[#allocation2 + $0x198] sm:$0xff] %v1866_v0 }
  0x75   : > { %294 = vst [vmem:[#allocation2 + $0x1a0] sm:$0xff] %v1866_v0  ;;  %295 = vst [vmem:[#allocation2 + $0x1a8] sm:$0xff] %v1866_v0  ;;  %v388_v0 = vadd.f32 %v2150_v33, %v2080_v5 }
  0x76   : > { %329 = vst [vmem:[#allocation2 + $0x19] sm:$0xff] %v2065_v1  ;;  %330 = vst [vmem:[#allocation2 + $0x21] sm:$0xff] %v2068_v2 }
  0x77   : > { %331 = vst [vmem:[#allocation2 + $0x31] sm:$0xff] %v2071_v3  ;;  %332 = vst [vmem:[#allocation2 + $0x39] sm:$0xff] %v2077_v4 }
  0x78   : > { %333 = vst [vmem:[#allocation2 + $0x49] sm:$0xff] %v2080_v5  ;;  %334 = vst [vmem:[#allocation2 + $0x51] sm:$0xff] %v2083_v6 }
  0x79   : > { %335 = vst [vmem:[#allocation2 + $0x61] sm:$0xff] %v2089_v7  ;;  %336 = vst [vmem:[#allocation2 + $0x69] sm:$0xff] %v2092_v8 }
  0x7a   : > { %337 = vst [vmem:[#allocation2 + $0x79] sm:$0xff] %v2095_v9  ;;  %338 = vst [vmem:[#allocation2 + $0x81] sm:$0xff] %v2101_v10 }
  0x7b   : > { %339 = vst [vmem:[#allocation2 + $0x91] sm:$0xff] %v2104_v11  ;;  %340 = vst [vmem:[#allocation2 + $0x99] sm:$0xff] %v2107_v12 }
  0x7c   : > { %341 = vst [vmem:[#allocation2 + $0xa9] sm:$0xff] %v2113_v13  ;;  %342 = vst [vmem:[#allocation2 + $0xb1] sm:$0xff] %v2116_v14 }
  0x7d   : > { %343 = vst [vmem:[#allocation2 + $0xc1] sm:$0xff] %v2119_v15  ;;  %344 = vst [vmem:[#allocation2 + $0xc9] sm:$0xff] %v2125_v16  ;;  %v559_v44 = vld [vmem:[#allocation2 + $0x18] sm:$0xff]  ;;  %v560_v63 = vld [vmem:[#allocation2 + $0x20] sm:$0xff] }
  0x7e   : > { %345 = vst [vmem:[#allocation2 + $0xd9] sm:$0xff] %v2128_v17  ;;  %346 = vst [vmem:[#allocation2 + $0xe1] sm:$0xff] %v313_v18  ;;  %v423_v46 = vmul.f32 %v2154_v35, %v559_v44  ;;  %v665_v51 = vld [vmem:[#allocation2 + $0x1a] sm:$0xff]  ;;  %v719_v53 = vld [vmem:[#allocation2 + $0x30] sm:$0xff]  ;;  %v580_v60 = vmul.f32 %v2166_v45, %v559_v44  ;;  %v478_v18 = vmul.f32 %v2156_v37, %v2071_v3 }
  0x7f   : > { %347 = vst [vmem:[#allocation2 + $0xf1] sm:$0xff] %v314_v19  ;;  %348 = vst [vmem:[#allocation2 + $0xf9] sm:$0xff] %v315_v20  ;;  %v633_v19 = vmul.f32 %v2172_v50, %v2065_v1  ;;  %v825_v20 = vld [vmem:[#allocation2 + $0x32] sm:$0xff]  ;;  %v2202_v36 = vld [vmem:[#allocation2 + $0x3a] sm:$0xff]  ;;  %v529_v38 = vmul.f32 %v2164_v43, %v665_v51  ;;  %v424_v48 = vmul.f32 %v2154_v35, %v560_v63 }
  0x80   : > { %349 = vst [vmem:[#allocation2 + $0x109] sm:$0xff] %v316_v21  ;;  %350 = vst [vmem:[#allocation2 + $0x111] sm:$0xff] %v317_v22  ;;  %v439_v56 = vadd.f32 %v423_v46, %v386_v39  ;;  %v2189_v21 = vld [vmem:[#allocation6 + $0x8] ss:$0 sm:$0xff]  ;;  %v475_v22 = vmul.f32 %v2156_v37, %v454_v61  ;;  %v635_v46 = vmul.f32 %v2172_v50, %v2071_v3 }
  0x81   : > { %351 = vst [vmem:[#allocation2 + $0x121] sm:$0xff] %v318_v23  ;;  %352 = vst [vmem:[#allocation2 + $0x129] sm:$0xff] %v319_v24  ;;  %v528_v23 = vmul.f32 %v2164_v43, %v507_v62  ;;  %v720_v34 = vld [vmem:[#allocation2 + $0x38] sm:$0xff]  ;;  %v846_v40 = vmul.f32 %v2189_v21, %v825_v20  ;;  %v688_v61 = vmul.f32 %v2174_v52, %v825_v20  ;;  %v2219_v62 = vld [vmem:[#allocation2 + $0x4a] sm:$0xff] }
  0x82   : > { %353 = vst [vmem:[#allocation2 + $0x139] sm:$0xff] %v320_v25  ;;  %354 = vst [vmem:[#allocation2 + $0x141] sm:$0xff] %v321_v26  ;;  %v492_v24 = vadd.f32 %v476_v47, %v439_v56  ;;  %v543_v25 = vadd.f32 %v527_v49, %v490_v59  ;;  %v686_v26 = vmul.f32 %v2174_v52, %v665_v51  ;;  %v2211_v47 = vld [vmem:[#allocation2 + $0x48] sm:$0xff] }
  0x83   : > { %355 = vst [vmem:[#allocation2 + $0x151] sm:$0xff] %v322_v27  ;;  %356 = vst [vmem:[#allocation2 + $0x159] sm:$0xff] %v323_v28  ;;  %v740_v27 = vmul.f32 %v2176_v54, %v719_v53  ;;  %v2195_v28 = vld [vmem:[#allocation6 + $0x7] ss:$0 sm:$0xff]  ;;  %v847_v56 = vmul.f32 %v2189_v21, %v2202_v36 }
  0x84   : > { %357 = vst [vmem:[#allocation2 + $0x169] sm:$0xff] %v324_v29  ;;  %358 = vst [vmem:[#allocation2 + $0x171] sm:$0xff] %v325_v30  ;;  %v634_v29 = vmul.f32 %v2172_v50, %v2068_v2  ;;  %v793_v1 = vmul.f32 %v2195_v28, %v2071_v3  ;;  %v491_v30 = vadd.f32 %v475_v22, %v438_v55 }
  0x85   : > { %359 = vst [vmem:[#allocation2 + $0x181] sm:$0xff] %v326_v31  ;;  %360 = vst [vmem:[#allocation2 + $0x189] sm:$0xff] %v327_v32  ;;  %v581_v31 = vmul.f32 %v2166_v45, %v560_v63  ;;  %v666_v32 = vld [vmem:[#allocation2 + $0x22] sm:$0xff]  ;;  %v596_v39 = vadd.f32 %v580_v60, %v543_v25  ;;  %v794_v41 = vmul.f32 %v2195_v28, %v2077_v4 }
  0x86   : > { %v582_v2 = vmul.f32 %v2166_v45, %v719_v53  ;;  %v544_v42 = vadd.f32 %v528_v23, %v491_v30  ;;  %v545_v44 = vadd.f32 %v529_v38, %v492_v24  ;;  %v687_v51 = vmul.f32 %v2174_v52, %v666_v32 }
  0x87   : > { %v649_v49 = vadd.f32 %v633_v19, %v596_v39  ;;  %v741_v55 = vmul.f32 %v2176_v54, %v720_v34  ;;  %v440_v22 = vadd.f32 %v424_v48, %v387_v57  ;;  %v742_v23 = vmul.f32 %v2176_v54, %v2211_v47 }
  0x88   : > { %v597_v59 = vadd.f32 %v581_v31, %v544_v42  ;;  %v598_v60 = vadd.f32 %v582_v2, %v545_v44  ;;  %v795_v63 = vmul.f32 %v2195_v28, %v2080_v5  ;;  %v530_v19 = vmul.f32 %v2164_v43, %v666_v32 }
  0x89   : > { %v702_v3 = vadd.f32 %v686_v26, %v649_v49  ;;  %v493_v30 = vadd.f32 %v477_v58, %v440_v22  ;;  %v425_v31 = vmul.f32 %v2154_v35, %v719_v53  ;;  %v848_v39 = vmul.f32 %v2189_v21, %v2219_v62 }
  0x8a   : > { %v650_v24 = vadd.f32 %v634_v29, %v597_v59  ;;  %v651_v25 = vadd.f32 %v635_v46, %v598_v60  ;;  %v583_v57 = vmul.f32 %v2166_v45, %v720_v34  ;;  %v636_v26 = vmul.f32 %v2172_v50, %v2077_v4  ;;  %v722_v59 = vld [vmem:[#allocation2 + $0x50] sm:$0xff] }
  0x8b   : > { %v756_v38 = vadd.f32 %v740_v27, %v702_v3  ;;  %v546_v44 = vadd.f32 %v530_v19, %v493_v30  ;;  %v441_v48 = vadd.f32 %v425_v31, %v388_v0  ;;  %v689_v29 = vmul.f32 %v2174_v52, %v2202_v36  ;;  %v2242_v19 = vld [vmem:[#allocation2 + $0x52] sm:$0xff] }
  0x8c   : > { %v703_v2 = vadd.f32 %v687_v51, %v650_v24  ;;  %v704_v42 = vadd.f32 %v688_v61, %v651_v25  ;;  %v531_v58 = vmul.f32 %v2164_v43, %v825_v20  ;;  %v584_v53 = vmul.f32 %v2166_v45, %v2211_v47 }
  0x8d   : > { %v809_v49 = vadd.f32 %v793_v1, %v756_v38  ;;  %v599_v46 = vadd.f32 %v583_v57, %v546_v44  ;;  %v494_v60 = vadd.f32 %v478_v18, %v441_v48  ;;  %v637_v51 = vmul.f32 %v2172_v50, %v2080_v5  ;;  %v723_v38 = vld [vmem:[#allocation2 + $0x60] sm:$0xff]  ;;  %v2267_v48 = vld [vmem:[#allocation2 + $0x68] sm:$0xff] }
  0x8e   : > { %v757_v27 = vadd.f32 %v741_v55, %v703_v2  ;;  %v758_v32 = vadd.f32 %v742_v23, %v704_v42  ;;  %v389_v0 = vadd.f32 %v2150_v33, %v2083_v6  ;;  %v426_v1 = vmul.f32 %v2154_v35, %v720_v34 }
  0x8f   : > { %v862_v22 = vadd.f32 %v846_v40, %v809_v49  ;;  %v652_v3 = vadd.f32 %v636_v26, %v599_v46  ;;  %v547_v24 = vadd.f32 %v531_v58, %v494_v60  ;;  %v743_v18 = vmul.f32 %v2176_v54, %v722_v59 }
  0x90   : > { %v810_v61 = vadd.f32 %v794_v41, %v757_v27  ;;  %v811_v20 = vadd.f32 %v795_v63, %v758_v32  ;;  %v796_v40 = vmul.f32 %v2195_v28, %v2083_v6  ;;  %v442_v55 = vadd.f32 %v426_v1, %v389_v0 }
  0x91   : > { %878 = vst [vmem:[%s2246_s24] sm:$0xff] %v862_v22  ;;  %v479_v34 = vmul.f32 %v2156_v37, %v2077_v4  ;;  %v705_v63 = vadd.f32 %v689_v29, %v652_v3  ;;  %v600_v25 = vadd.f32 %v584_v53, %v547_v24  ;;  %v849_v30 = vmul.f32 %v2189_v21, %v2242_v19  ;;  %v2262_v4 = vld [vmem:[#allocation2 + $0x62] sm:$0xff] }
  0x92   : > { %v863_v41 = vadd.f32 %v847_v56, %v810_v61  ;;  %v864_v23 = vadd.f32 %v848_v39, %v811_v20  ;;  %v690_v31 = vmul.f32 %v2174_v52, %v2219_v62  ;;  %v532_v26 = vmul.f32 %v2164_v43, %v2202_v36  ;;  %v2284_v61 = vld [vmem:[#allocation2 + $0x6a] sm:$0xff] }
  0x93   : > { %v495_v57 = vadd.f32 %v479_v34, %v442_v55  ;;  %v759_v2 = vadd.f32 %v743_v18, %v705_v63  ;;  %v653_v42 = vadd.f32 %v637_v51, %v600_v25  ;;  %v585_v56 = vmul.f32 %v2166_v45, %v722_v59  ;;  %v725_v55 = vld [vmem:[#allocation2 + $0x78] sm:$0xff] }
  0x94   : > { %879 = vst [vmem:[%s2246_s24 + $0x8] sm:$0xff] %v863_v41  ;;  %880 = vst [vmem:[%s2246_s24 + $0x10] sm:$0xff] %v864_v23  ;;  %v638_v39 = vmul.f32 %v2172_v50, %v2083_v6  ;;  %v390_v49 = vadd.f32 %v2150_v33, %v2089_v7  ;;  %v427_v36 = vmul.f32 %v2154_v35, %v2211_v47 }
  0x95   : > { %v548_v44 = vadd.f32 %v532_v26, %v495_v57  ;;  %v480_v29 = vmul.f32 %v2156_v37, %v2080_v5  ;;  %v812_v58 = vadd.f32 %v796_v40, %v759_v2  ;;  %v706_v53 = vadd.f32 %v690_v31, %v653_v42  ;;  %v2303_v26 = vld [vmem:[#allocation2 + $0x7a] sm:$0xff] }
  0x96   : > { %v744_v27 = vmul.f32 %v2176_v54, %v723_v38  ;;  %v797_v32 = vmul.f32 %v2195_v28, %v2089_v7  ;;  %v850_v46 = vmul.f32 %v2189_v21, %v2262_v4  ;;  %v443_v22 = vadd.f32 %v427_v36, %v390_v49 }
  0x97   : > { %v601_v60 = vadd.f32 %v585_v56, %v548_v44  ;;  %v865_v51 = vadd.f32 %v849_v30, %v812_v58  ;;  %v691_v47 = vmul.f32 %v2174_v52, %v2242_v19  ;;  %v745_v5 = vmul.f32 %v2176_v54, %v2267_v48  ;;  %v2309_v44 = vld [vmem:[#allocation2 + $0x80] sm:$0xff] }
  0x98   : > { %v760_v0 = vadd.f32 %v744_v27, %v706_v53  ;;  %v496_v20 = vadd.f32 %v480_v29, %v443_v22  ;;  %v533_v3 = vmul.f32 %v2164_v43, %v2219_v62  ;;  %v391_v24 = vadd.f32 %v2150_v33, %v2092_v8 }
  0x99   : > { %v654_v1 = vadd.f32 %v638_v39, %v601_v60  ;;  %881 = vst [vmem:[%s2246_s24 + $0x18] sm:$0xff] %v865_v51  ;;  %v798_v40 = vmul.f32 %v2195_v28, %v2092_v8  ;;  %v428_v34 = vmul.f32 %v2154_v35, %v722_v59  ;;  %v481_v41 = vmul.f32 %v2156_v37, %v2083_v6 }
  0x9a   : > { %v813_v18 = vadd.f32 %v797_v32, %v760_v0  ;;  %v549_v63 = vadd.f32 %v533_v3, %v496_v20  ;;  %v586_v25 = vmul.f32 %v2166_v45, %v723_v38  ;;  %v639_v62 = vmul.f32 %v2172_v50, %v2089_v7 }
  0x9b   : > { %v707_v23 = vadd.f32 %v691_v47, %v654_v1  ;;  %v851_v31 = vmul.f32 %v2189_v21, %v2284_v61  ;;  %v692_v57 = vmul.f32 %v2174_v52, %v2262_v4  ;;  %v444_v59 = vadd.f32 %v428_v34, %v391_v24 }
  0x9c   : > { %v866_v30 = vadd.f32 %v850_v46, %v813_v18  ;;  %v602_v42 = vadd.f32 %v586_v25, %v549_v63  ;;  %v746_v6 = vmul.f32 %v2176_v54, %v725_v55  ;;  %v534_v56 = vmul.f32 %v2164_v43, %v2242_v19 }
  0x9d   : > { %v761_v2 = vadd.f32 %v745_v5, %v707_v23  ;;  %v497_v39 = vadd.f32 %v481_v41, %v444_v59  ;;  %v392_v49 = vadd.f32 %v2150_v33, %v2095_v9  ;;  %v429_v36 = vmul.f32 %v2154_v35, %v723_v38  ;;  %v2328_v5 = vld [vmem:[#allocation2 + $0x82] sm:$0xff] }
  0x9e   : > { %882 = vst [vmem:[%s2246_s24 + $0x20] sm:$0xff] %v866_v30  ;;  %v482_v29 = vmul.f32 %v2156_v37, %v2089_v7  ;;  %v655_v53 = vadd.f32 %v639_v62, %v602_v42  ;;  %v799_v27 = vmul.f32 %v2195_v28, %v2095_v9  ;;  %v852_v19 = vmul.f32 %v2189_v21, %v2303_v26 }
  0x9f   : > { %v814_v58 = vadd.f32 %v798_v40, %v761_v2  ;;  %v550_v32 = vadd.f32 %v534_v56, %v497_v39  ;;  %v587_v46 = vmul.f32 %v2166_v45, %v2267_v48  ;;  %v640_v60 = vmul.f32 %v2172_v50, %v2092_v8  ;;  %v2337_v40 = vld [vmem:[#allocation2 + $0x90] sm:$0xff] }
  0xa0   : > { %v445_v38 = vadd.f32 %v429_v36, %v392_v49  ;;  %v708_v51 = vadd.f32 %v692_v57, %v655_v53  ;;  %v693_v7 = vmul.f32 %v2174_v52, %v2284_v61  ;;  %v747_v0 = vmul.f32 %v2176_v54, %v2309_v44 }
  0xa1   : > { %v867_v22 = vadd.f32 %v851_v31, %v814_v58  ;;  %v603_v47 = vadd.f32 %v587_v46, %v550_v32  ;;  %v535_v20 = vmul.f32 %v2164_v43, %v2262_v4  ;;  %v393_v3 = vadd.f32 %v2150_v33, %v2101_v10 }
  0xa2   : > { %v498_v1 = vadd.f32 %v482_v29, %v445_v38  ;;  %v762_v24 = vadd.f32 %v746_v6, %v708_v51  ;;  %v800_v18 = vmul.f32 %v2195_v28, %v2101_v10  ;;  %v430_v34 = vmul.f32 %v2154_v35, %v2267_v48  ;;  %v2354_v6 = vld [vmem:[#allocation2 + $0x92] sm:$0xff] }
  0xa3   : > { %883 = vst [vmem:[%s2246_s24 + $0x28] sm:$0xff] %v867_v22  ;;  %v483_v41 = vmul.f32 %v2156_v37, %v2092_v8  ;;  %v656_v23 = vadd.f32 %v640_v60, %v603_v47  ;;  %v588_v4 = vmul.f32 %v2166_v45, %v725_v55  ;;  %v641_v25 = vmul.f32 %v2172_v50, %v2095_v9 }
  0xa4   : > { %v551_v63 = vadd.f32 %v535_v20, %v498_v1  ;;  %v815_v62 = vadd.f32 %v799_v27, %v762_v24  ;;  %v853_v30 = vmul.f32 %v2189_v21, %v2328_v5  ;;  %v694_v31 = vmul.f32 %v2174_v52, %v2303_v26  ;;  %v2376_v20 = vld [vmem:[#allocation2 + $0x9a] sm:$0xff] }
  0xa5   : > { %v446_v57 = vadd.f32 %v430_v34, %v393_v3  ;;  %v709_v48 = vadd.f32 %v693_v7, %v656_v23  ;;  %v748_v8 = vmul.f32 %v2176_v54, %v2337_v40  ;;  %v536_v2 = vmul.f32 %v2164_v43, %v2284_v61  ;;  %v2384_v23 = vld [vmem:[#allocation2 + $0xa8] sm:$0xff] }
  0xa6   : > { %v604_v59 = vadd.f32 %v588_v4, %v551_v63  ;;  %v868_v42 = vadd.f32 %v852_v19, %v815_v62  ;;  %v394_v39 = vadd.f32 %v2150_v33, %v2104_v11  ;;  %v431_v49 = vmul.f32 %v2154_v35, %v725_v55 }
  0xa7   : > { %v499_v56 = vadd.f32 %v483_v41, %v446_v57  ;;  %v763_v36 = vadd.f32 %v747_v0, %v709_v48  ;;  %v801_v58 = vmul.f32 %v2195_v28, %v2104_v11  ;;  %v484_v53 = vmul.f32 %v2156_v37, %v2095_v9  ;;  %v728_v9 = vld [vmem:[#allocation2 + $0x98] sm:$0xff] }
  0xa8   : > { %v657_v29 = vadd.f32 %v641_v25, %v604_v59  ;;  %884 = vst [vmem:[%s2246_s24 + $0x30] sm:$0xff] %v868_v42  ;;  %v589_v61 = vmul.f32 %v2166_v45, %v2309_v44  ;;  %v642_v19 = vmul.f32 %v2172_v50, %v2101_v10  ;;  %v447_v32 = vadd.f32 %v431_v49, %v394_v39 }
  0xa9   : > { %v552_v27 = vadd.f32 %v536_v2, %v499_v56  ;;  %v816_v46 = vadd.f32 %v800_v18, %v763_v36  ;;  %v854_v55 = vmul.f32 %v2189_v21, %v2354_v6  ;;  %v695_v38 = vmul.f32 %v2174_v52, %v2328_v5  ;;  %v835_v56 = vld [vmem:[#allocation2 + $0xaa] sm:$0xff] }
  0xaa   : > { %v710_v60 = vadd.f32 %v694_v31, %v657_v29  ;;  %v500_v51 = vadd.f32 %v484_v53, %v447_v32  ;;  %v537_v7 = vmul.f32 %v2164_v43, %v2303_v26  ;;  %v590_v0 = vmul.f32 %v2166_v45, %v2337_v40 }
  0xab   : > { %v605_v22 = vadd.f32 %v589_v61, %v552_v27  ;;  %v869_v47 = vadd.f32 %v853_v30, %v816_v46  ;;  %v395_v3 = vadd.f32 %v2150_v33, %v2107_v12  ;;  %v432_v24 = vmul.f32 %v2154_v35, %v2309_v44 }
  0xac   : > { %v764_v1 = vadd.f32 %v748_v8, %v710_v60  ;;  %v553_v34 = vadd.f32 %v537_v7, %v500_v51  ;;  %v643_v41 = vmul.f32 %v2172_v50, %v2104_v11  ;;  %v485_v26 = vmul.f32 %v2156_v37, %v2101_v10  ;;  %v2417_v7 = vld [vmem:[#allocation2 + $0xb2] sm:$0xff] }
  0xad   : > { %v658_v18 = vadd.f32 %v642_v19, %v605_v22  ;;  %885 = vst [vmem:[%s2246_s24 + $0x38] sm:$0xff] %v869_v47  ;;  %v749_v4 = vmul.f32 %v2176_v54, %v728_v9  ;;  %v802_v25 = vmul.f32 %v2195_v28, %v2107_v12  ;;  %v448_v62 = vadd.f32 %v432_v24, %v395_v3 }
  0xae   : > { %v817_v63 = vadd.f32 %v801_v58, %v764_v1  ;;  %v855_v30 = vmul.f32 %v2189_v21, %v2376_v20  ;;  %v606_v31 = vadd.f32 %v590_v0, %v553_v34  ;;  %v696_v57 = vmul.f32 %v2174_v52, %v2354_v6 }
  0xaf   : > { %v711_v44 = vadd.f32 %v695_v38, %v658_v18  ;;  %v750_v10 = vmul.f32 %v2176_v54, %v2384_v23  ;;  %v501_v59 = vadd.f32 %v485_v26, %v448_v62  ;;  %v538_v8 = vmul.f32 %v2164_v43, %v2328_v5  ;;  %v730_v38 = vld [vmem:[#allocation2 + $0xb0] sm:$0xff]  ;;  %v731_v62 = vld [vmem:[#allocation2 + $0xc0] sm:$0xff] }
  0xb0   : > { %v870_v48 = vadd.f32 %v854_v55, %v817_v63  ;;  %v659_v42 = vadd.f32 %v643_v41, %v606_v31  ;;  %v396_v39 = vadd.f32 %v2150_v33, %v2113_v13  ;;  %v433_v49 = vmul.f32 %v2154_v35, %v2337_v40 }
  0xb1   : > { %v765_v2 = vadd.f32 %v749_v4, %v711_v44  ;;  %v554_v36 = vadd.f32 %v538_v8, %v501_v59  ;;  %v591_v29 = vmul.f32 %v2166_v45, %v728_v9  ;;  %v644_v58 = vmul.f32 %v2172_v50, %v2107_v12 }
  0xb2   : > { %886 = vst [vmem:[%s2246_s24 + $0x40] sm:$0xff] %v870_v48  ;;  %v486_v53 = vmul.f32 %v2156_v37, %v2104_v11  ;;  %v712_v27 = vadd.f32 %v696_v57, %v659_v42  ;;  %v803_v61 = vmul.f32 %v2195_v28, %v2113_v13  ;;  %v449_v19 = vadd.f32 %v433_v49, %v396_v39 }
  0xb3   : > { %v818_v5 = vadd.f32 %v802_v25, %v765_v2  ;;  %v856_v32 = vmul.f32 %v2189_v21, %v835_v56  ;;  %v607_v40 = vadd.f32 %v591_v29, %v554_v36  ;;  %v697_v46 = vmul.f32 %v2174_v52, %v2376_v20 }
  0xb4   : > { %v766_v55 = vadd.f32 %v750_v10, %v712_v27  ;;  %v502_v22 = vadd.f32 %v486_v53, %v449_v19  ;;  %v539_v11 = vmul.f32 %v2164_v43, %v2354_v6  ;;  %v397_v0 = vadd.f32 %v2150_v33, %v2116_v14  ;;  %v2440_v10 = vld [vmem:[#allocation2 + $0xc2] sm:$0xff]  ;;  %v2455_v19 = vld [vmem:[#allocation2 + $0xca] sm:$0xff] }
  0xb5   : > { %v871_v60 = vadd.f32 %v855_v30, %v818_v5  ;;  %v660_v51 = vadd.f32 %v644_v58, %v607_v40  ;;  %v434_v47 = vmul.f32 %v2154_v35, %v728_v9  ;;  %v487_v1 = vmul.f32 %v2156_v37, %v2107_v12 }
  0xb6   : > { %v819_v3 = vadd.f32 %v803_v61, %v766_v55  ;;  %v555_v24 = vadd.f32 %v539_v11, %v502_v22  ;;  %v592_v18 = vmul.f32 %v2166_v45, %v2384_v23  ;;  %v645_v6 = vmul.f32 %v2172_v50, %v2113_v13  ;;  %v732_v61 = vld [vmem:[#allocation2 + $0xc8] sm:$0xff] }
  0xb7   : > { %887 = vst [vmem:[%s2246_s24 + $0x48] sm:$0xff] %v871_v60  ;;  %v713_v34 = vadd.f32 %v697_v46, %v660_v51  ;;  %v751_v41 = vmul.f32 %v2176_v54, %v730_v38  ;;  %v804_v26 = vmul.f32 %v2195_v28, %v2116_v14  ;;  %v450_v9 = vadd.f32 %v434_v47, %v397_v0 }
  0xb8   : > { %v872_v63 = vadd.f32 %v856_v32, %v819_v3  ;;  %v857_v12 = vmul.f32 %v2189_v21, %v2417_v7  ;;  %v608_v4 = vadd.f32 %v592_v18, %v555_v24  ;;  %v540_v30 = vmul.f32 %v2164_v43, %v2376_v20 }
  0xb9   : > { %v767_v25 = vadd.f32 %v751_v41, %v713_v34  ;;  %v503_v44 = vadd.f32 %v487_v1, %v450_v9  ;;  %v398_v31 = vadd.f32 %v2150_v33, %v2119_v15  ;;  %v698_v48 = vmul.f32 %v2174_v52, %v835_v56  ;;  %v1578_v1 = vld [vmem:[%s2054_s19 + $0x80] sm:$0xff]  ;;  %v733_v34 = vld [vmem:[#allocation2 + $0xd8] sm:$0xff] }
  0xba   : > { %888 = vst [vmem:[%s2246_s24 + $0x50] sm:$0xff] %v872_v63  ;;  %v661_v57 = vadd.f32 %v645_v6, %v608_v4  ;;  %v435_v59 = vmul.f32 %v2154_v35, %v2384_v23  ;;  %v488_v8 = vmul.f32 %v2156_v37, %v2113_v13  ;;  %v593_v39 = vmul.f32 %v2166_v45, %v730_v38 }
  0xbb   : > { %v820_v2 = vadd.f32 %v804_v26, %v767_v25  ;;  %v556_v42 = vadd.f32 %v540_v30, %v503_v44  ;;  %v646_v20 = vmul.f32 %v2172_v50, %v2116_v14  ;;  %v752_v36 = vmul.f32 %v2176_v54, %v731_v62  ;;  %v988_v26 = vld [vmem:[#allocation2 + $0xc1] sm:$0xff] }
  0xbc   : > { %v714_v49 = vadd.f32 %v698_v48, %v661_v57  ;;  %v805_v29 = vmul.f32 %v2195_v28, %v2119_v15  ;;  %v451_v58 = vadd.f32 %v435_v59, %v398_v31  ;;  %v858_v23 = vmul.f32 %v2189_v21, %v2440_v10 }
  0xbd   : > { %v873_v53 = vadd.f32 %v857_v12, %v820_v2  ;;  %v609_v13 = vadd.f32 %v593_v39, %v556_v42  ;;  %v541_v5 = vmul.f32 %v2164_v43, %v835_v56  ;;  %v399_v40 = vadd.f32 %v2150_v33, %v2125_v16  ;;  %v2478_v12 = vld [vmem:[#allocation2 + $0xda] sm:$0xff] }
  0xbe   : > { %v768_v27 = vadd.f32 %v752_v36, %v714_v49  ;;  %v504_v32 = vadd.f32 %v488_v8, %v451_v58  ;;  %v436_v46 = vmul.f32 %v2154_v35, %v730_v38  ;;  %v699_v55 = vmul.f32 %v2174_v52, %v2417_v7  ;;  %v734_v49 = vld [vmem:[#allocation2 + $0xe0] sm:$0xff] }
  0xbf   : > { %889 = vst [vmem:[%s2246_s24 + $0x58] sm:$0xff] %v873_v53  ;;  %v662_v60 = vadd.f32 %v646_v20, %v609_v13  ;;  %v594_v22 = vmul.f32 %v2166_v45, %v731_v62  ;;  %v489_v56 = vmul.f32 %v2156_v37, %v2116_v14  ;;  %v647_v0 = vmul.f32 %v2172_v50, %v2119_v15  ;;  %v2493_v36 = vld [vmem:[#allocation2 + $0xe1] sm:$0xff] }
  0xc0   : > { %v821_v11 = vadd.f32 %v805_v29, %v768_v27  ;;  %v557_v51 = vadd.f32 %v541_v5, %v504_v32  ;;  %v452_v47 = vadd.f32 %v436_v46, %v399_v40  ;;  %v753_v38 = vmul.f32 %v2176_v54, %v732_v61  ;;  %v2500_v27 = vld [vmem:[#allocation2 + $0xe2] sm:$0xff]  ;;  %v1148_v32 = vld [vmem:[#allocation2 + $0xd9] sm:$0xff] }
  0xc1   : > { %v715_v3 = vadd.f32 %v699_v55, %v662_v60  ;;  %v806_v24 = vmul.f32 %v2195_v28, %v2125_v16  ;;  %v859_v18 = vmul.f32 %v2189_v21, %v2455_v19  ;;  %v542_v15 = vmul.f32 %v2164_v43, %v2417_v7  ;;  %v1579_v7 = vld [vmem:[%s2054_s19 + $0x88] sm:$0xff] }
  0xc2   : > { %v874_v6 = vadd.f32 %v858_v23, %v821_v11  ;;  %v610_v14 = vadd.f32 %v594_v22, %v557_v51  ;;  %v505_v41 = vadd.f32 %v489_v56, %v452_v47  ;;  %v700_v63 = vmul.f32 %v2174_v52, %v2440_v10  ;;  %v989_v23 = vld [vmem:[#allocation2 + $0xc9] sm:$0xff]  ;;  %v1580_v22 = vld [vmem:[%s2054_s19 + $0x90] sm:$0xff] }
  0xc3   : > { %v769_v9 = vadd.f32 %v753_v38, %v715_v3  ;;  %v918_v4 = vadd.f32 %v1578_v1, %v2150_v33  ;;  %v956_v25 = vmul.f32 %v2154_v35, %v731_v62  ;;  %v595_v31 = vmul.f32 %v2166_v45, %v732_v61  ;;  %v1255_v51 = vld [vmem:[#allocation2 + $0xf0] sm:$0xff] }
  0xc4   : > { %890 = vst [vmem:[%s2246_s24 + $0x60] sm:$0xff] %v874_v6  ;;  %v663_v44 = vadd.f32 %v647_v0, %v610_v14  ;;  %v558_v30 = vadd.f32 %v542_v15, %v505_v41  ;;  %v648_v57 = vmul.f32 %v2172_v50, %v2125_v16  ;;  %v754_v59 = vmul.f32 %v2176_v54, %v733_v34  ;;  %v2513_v38 = vld [vmem:[#allocation2 + $0xf1] sm:$0xff] }
  0xc5   : > { %v822_v48 = vadd.f32 %v806_v24, %v769_v9  ;;  %v972_v8 = vadd.f32 %v956_v25, %v918_v4  ;;  %v1009_v2 = vmul.f32 %v2156_v37, %v988_v26  ;;  %v807_v39 = vmul.f32 %v2195_v28, %v2128_v17  ;;  %v2517_v14 = vld [vmem:[#allocation2 + $0xf2] sm:$0xff] }
  0xc6   : > { %v716_v42 = vadd.f32 %v700_v63, %v663_v44  ;;  %v860_v62 = vmul.f32 %v2189_v21, %v2478_v12  ;;  %v611_v20 = vadd.f32 %v595_v31, %v558_v30  ;;  %v1062_v58 = vmul.f32 %v2164_v43, %v2440_v10  ;;  %v1581_v31 = vld [vmem:[%s2054_s19 + $0x98] sm:$0xff] }
  0xc7   : > { %v875_v16 = vadd.f32 %v859_v18, %v822_v48  ;;  %v1025_v29 = vadd.f32 %v1009_v2, %v972_v8  ;;  %v919_v53 = vadd.f32 %v1579_v7, %v2150_v33  ;;  %v701_v17 = vmul.f32 %v2174_v52, %v2455_v19  ;;  %v1256_v48 = vld [vmem:[#allocation2 + $0xf8] sm:$0xff] }
  0xc8   : > { %v770_v13 = vadd.f32 %v754_v59, %v716_v42  ;;  %v664_v5 = vadd.f32 %v648_v57, %v611_v20  ;;  %v957_v40 = vmul.f32 %v2154_v35, %v732_v61  ;;  %v755_v46 = vmul.f32 %v2176_v54, %v734_v49  ;;  %v2536_v20 = vld [vmem:[#allocation2 + $0xf9] sm:$0xff] }
  0xc9   : > { %891 = vst [vmem:[%s2246_s24 + $0x68] sm:$0xff] %v875_v16  ;;  %v808_v60 = vmul.f32 %v2195_v28, %v2493_v36  ;;  %v1078_v10 = vadd.f32 %v1062_v58, %v1025_v29  ;;  %v1116_v55 = vmul.f32 %v2166_v45, %v733_v34  ;;  %v1010_v47 = vmul.f32 %v2156_v37, %v989_v23  ;;  %v2538_v16 = vld [vmem:[#allocation2 + $0xfa] sm:$0xff] }
  0xca   : > { %v823_v56 = vadd.f32 %v807_v39, %v770_v13  ;;  %v717_v11 = vadd.f32 %v701_v17, %v664_v5  ;;  %v973_v0 = vadd.f32 %v957_v40, %v919_v53  ;;  %v861_v61 = vmul.f32 %v2189_v21, %v2500_v27 }
  0xcb   : > { %v1132_v1 = vadd.f32 %v1116_v55, %v1078_v10  ;;  %v1169_v3 = vmul.f32 %v2172_v50, %v1148_v32  ;;  %v1063_v24 = vmul.f32 %v2164_v43, %v2455_v19  ;;  %v920_v15 = vadd.f32 %v1580_v22, %v2150_v33 }
  0xcc   : > { %v876_v18 = vadd.f32 %v860_v62, %v823_v56  ;;  %v771_v6 = vadd.f32 %v755_v46, %v717_v11  ;;  %v1026_v41 = vadd.f32 %v1010_v47, %v973_v0  ;;  %v1222_v9 = vmul.f32 %v2174_v52, %v2478_v12  ;;  %v1257_v56 = vld [vmem:[#allocation2 + $0x108] sm:$0xff] }
  0xcd   : > { %v1185_v26 = vadd.f32 %v1169_v3, %v1132_v1  ;;  %v1276_v63 = vmul.f32 %v2176_v54, %v1255_v51  ;;  %v958_v4 = vmul.f32 %v2154_v35, %v733_v34  ;;  %v1329_v19 = vmul.f32 %v2195_v28, %v2513_v38  ;;  %v2556_v47 = vld [vmem:[#allocation2 + $0x109] sm:$0xff] }
  0xce   : > { %892 = vst [vmem:[%s2246_s24 + $0x70] sm:$0xff] %v876_v18  ;;  %v824_v25 = vadd.f32 %v808_v60, %v771_v6  ;;  %v1079_v44 = vadd.f32 %v1063_v24, %v1026_v41  ;;  %v1117_v30 = vmul.f32 %v2166_v45, %v734_v49  ;;  %v1382_v7 = vmul.f32 %v2189_v21, %v2517_v14  ;;  %v1582_v60 = vld [vmem:[%s2054_s19 + $0xa0] sm:$0xff] }
  0xcf   : > { %v1238_v57 = vadd.f32 %v1222_v9, %v1185_v26  ;;  %v974_v59 = vadd.f32 %v958_v4, %v920_v15  ;;  %v1011_v8 = vmul.f32 %v2156_v37, %v1148_v32  ;;  %v1170_v42 = vmul.f32 %v2172_v50, %v2493_v36  ;;  %v2562_v24 = vld [vmem:[#allocation2 + $0x10a] sm:$0xff] }
  0xd0   : > { %v877_v2 = vadd.f32 %v861_v61, %v824_v25  ;;  %v1133_v34 = vadd.f32 %v1117_v30, %v1079_v44  ;;  %v1064_v39 = vmul.f32 %v2164_v43, %v2478_v12  ;;  %v921_v58 = vadd.f32 %v1581_v31, %v2150_v33 }
  0xd1   : > { %v1292_v62 = vadd.f32 %v1276_v63, %v1238_v57  ;;  %v1027_v29 = vadd.f32 %v1011_v8, %v974_v59  ;;  %v959_v53 = vmul.f32 %v2154_v35, %v734_v49  ;;  %v1223_v13 = vmul.f32 %v2174_v52, %v2500_v27  ;;  %v1583_v63 = vld [vmem:[%s2054_s19 + $0xa8] sm:$0xff]  ;;  %v1258_v57 = vld [vmem:[#allocation2 + $0x110] sm:$0xff] }
  0xd2   : > { %893 = vst [vmem:[%s2246_s24 + $0x78] sm:$0xff] %v877_v2  ;;  %v1186_v23 = vadd.f32 %v1170_v42, %v1133_v34  ;;  %v1277_v5 = vmul.f32 %v2176_v54, %v1256_v48  ;;  %v1118_v12 = vmul.f32 %v2166_v45, %v1255_v51  ;;  %v1012_v46 = vmul.f32 %v2156_v37, %v2493_v36 }
  0xd3   : > { %v1345_v17 = vadd.f32 %v1329_v19, %v1292_v62  ;;  %v1080_v32 = vadd.f32 %v1064_v39, %v1027_v29  ;;  %v975_v40 = vadd.f32 %v959_v53, %v921_v58  ;;  %v1330_v49 = vmul.f32 %v2195_v28, %v2536_v20  ;;  %v2585_v62 = vld [vmem:[#allocation2 + $0x112] sm:$0xff] }
  0xd4   : > { %v1239_v10 = vadd.f32 %v1223_v13, %v1186_v23  ;;  %v1383_v55 = vmul.f32 %v2189_v21, %v2538_v16  ;;  %v1171_v22 = vmul.f32 %v2172_v50, %v2513_v38  ;;  %v1065_v36 = vmul.f32 %v2164_v43, %v2500_v27  ;;  %v1584_v13 = vld [vmem:[%s2054_s19 + $0xb0] sm:$0xff] }
  0xd5   : > { %v1398_v11 = vadd.f32 %v1382_v7, %v1345_v17  ;;  %v1134_v0 = vadd.f32 %v1118_v12, %v1080_v32  ;;  %v1028_v61 = vadd.f32 %v1012_v46, %v975_v40  ;;  %v1224_v3 = vmul.f32 %v2174_v52, %v2517_v14  ;;  %v2578_v7 = vld [vmem:[#allocation2 + $0x111] sm:$0xff]  ;;  %v2594_v17 = vld [vmem:[#allocation2 + $0x120] sm:$0xff] }
  0xd6   : > { %v1293_v1 = vadd.f32 %v1277_v5, %v1239_v10  ;;  %v922_v18 = vadd.f32 %v1582_v60, %v2150_v33  ;;  %v960_v6 = vmul.f32 %v2154_v35, %v1255_v51  ;;  %v1278_v15 = vmul.f32 %v2176_v54, %v1257_v56  ;;  %v2602_v10 = vld [vmem:[#allocation2 + $0x121] sm:$0xff] }
  0xd7   : > { %1604 = vst [vmem:[%s2246_s24 + $0x80] sm:$0xff] %v1398_v11  ;;  %v1187_v41 = vadd.f32 %v1171_v22, %v1134_v0  ;;  %v1081_v26 = vadd.f32 %v1065_v36, %v1028_v61  ;;  %v1119_v9 = vmul.f32 %v2166_v45, %v1256_v48  ;;  %v1331_v27 = vmul.f32 %v2195_v28, %v2556_v47  ;;  %v2606_v11 = vld [vmem:[#allocation2 + $0x122] sm:$0xff] }
  0xd8   : > { %v1346_v4 = vadd.f32 %v1330_v49, %v1293_v1  ;;  %v976_v25 = vadd.f32 %v960_v6, %v922_v18  ;;  %v1013_v19 = vmul.f32 %v2156_v37, %v2513_v38  ;;  %v1384_v51 = vmul.f32 %v2189_v21, %v2562_v24 }
  0xd9   : > { %v1240_v44 = vadd.f32 %v1224_v3, %v1187_v41  ;;  %v1135_v30 = vadd.f32 %v1119_v9, %v1081_v26  ;;  %v1172_v31 = vmul.f32 %v2172_v50, %v2536_v20  ;;  %v1066_v2 = vmul.f32 %v2164_v43, %v2517_v14  ;;  %v2621_v9 = vld [vmem:[#allocation2 + $0x128] sm:$0xff] }
  0xda   : > { %v1399_v59 = vadd.f32 %v1383_v55, %v1346_v4  ;;  %v1029_v8 = vadd.f32 %v1013_v19, %v976_v25  ;;  %v923_v38 = vadd.f32 %v1583_v63, %v2150_v33  ;;  %v1225_v39 = vmul.f32 %v2174_v52, %v2538_v16 }
  0xdb   : > { %v1294_v34 = vadd.f32 %v1278_v15, %v1240_v44  ;;  %v1188_v42 = vadd.f32 %v1172_v31, %v1135_v30  ;;  %v961_v29 = vmul.f32 %v2154_v35, %v1256_v48  ;;  %v1279_v58 = vmul.f32 %v2176_v54, %v1258_v57  ;;  %v1585_v15 = vld [vmem:[%s2054_s19 + $0xb8] sm:$0xff] }
  0xdc   : > { %1605 = vst [vmem:[%s2246_s24 + $0x88] sm:$0xff] %v1399_v59  ;;  %v1332_v53 = vmul.f32 %v2195_v28, %v2578_v7  ;;  %v1082_v23 = vadd.f32 %v1066_v2, %v1029_v8  ;;  %v1120_v14 = vmul.f32 %v2166_v45, %v1257_v56  ;;  %v1014_v40 = vmul.f32 %v2156_v37, %v2536_v20  ;;  %v2631_v30 = vld [vmem:[#allocation2 + $0x12a] sm:$0xff]  ;;  %v2636_v59 = vld [vmem:[%s2907_s2] ss:$0 sm:$0xff] }
  0xdd   : > { %v1347_v5 = vadd.f32 %v1331_v27, %v1294_v34  ;;  %v1241_v12 = vadd.f32 %v1225_v39, %v1188_v42  ;;  %v977_v32 = vadd.f32 %v961_v29, %v923_v38  ;;  %v1385_v48 = vmul.f32 %v2189_v21, %v2585_v62  ;;  %v2647_v39 = vld [vmem:[#allocation6 + $0x1] ss:$0 sm:$0xff] }
  0xde   : > { %v1136_v46 = vadd.f32 %v1120_v14, %v1082_v23  ;;  %v1173_v60 = vmul.f32 %v2172_v50, %v2556_v47  ;;  %v1067_v49 = vmul.f32 %v2164_v43, %v2538_v16  ;;  %v924_v20 = vadd.f32 %v1584_v13, %v2150_v33  ;;  %v2660_v14 = vld [vmem:[#allocation2 + $0x139] sm:$0xff] }
  0xdf   : > { %v1400_v55 = vadd.f32 %v1384_v51, %v1347_v5  ;;  %v1295_v22 = vadd.f32 %v1279_v58, %v1241_v12  ;;  %v1030_v0 = vadd.f32 %v1014_v40, %v977_v32  ;;  %v1226_v36 = vmul.f32 %v2174_v52, %v2562_v24  ;;  %v2629_v51 = vld [vmem:[#allocation2 + $0x129] sm:$0xff]  ;;  %v2666_v32 = vld [vmem:[#allocation6 + $0x5] ss:$0 sm:$0xff] }
  0xe0   : > { %v1189_v61 = vadd.f32 %v1173_v60, %v1136_v46  ;;  %v1280_v1 = vmul.f32 %v2176_v54, %v2594_v17  ;;  %v962_v3 = vmul.f32 %v2154_v35, %v1257_v56  ;;  %v1333_v16 = vmul.f32 %v2195_v28, %v2602_v10 }
  0xe1   : > { %1606 = vst [vmem:[%s2246_s24 + $0x90] sm:$0xff] %v1400_v55  ;;  %v1348_v18 = vadd.f32 %v1332_v53, %v1295_v22  ;;  %v1083_v6 = vadd.f32 %v1067_v49, %v1030_v0  ;;  %v1121_v41 = vmul.f32 %v2166_v45, %v1258_v57  ;;  %v1386_v33 = vmul.f32 %v2189_v21, %v2606_v11  ;;  %v2678_v49 = vld [vmem:[#allocation6 + $0x6] ss:$0 sm:$0xff]  ;;  %v2682_v22 = vld [vmem:[#allocation6 + $0x3] ss:$0 sm:$0xff] }
  0xe2   : > { %v1242_v26 = vadd.f32 %v1226_v36, %v1189_v61  ;;  %v978_v63 = vadd.f32 %v962_v3, %v924_v20  ;;  %v1015_v56 = vmul.f32 %v2156_v37, %v2556_v47  ;;  %v1174_v25 = vmul.f32 %v2172_v50, %v2578_v7  ;;  %v1587_v20 = vld [vmem:[%s2054_s19 + $0xc8] sm:$0xff] }
  0xe3   : > { %v1401_v4 = vadd.f32 %v1385_v48, %v1348_v18  ;;  %v1137_v27 = vadd.f32 %v1121_v41, %v1083_v6  ;;  %v1068_v19 = vmul.f32 %v2164_v43, %v2562_v24  ;;  %v925_v37 = vadd.f32 %v2636_v59, %v1585_v15  ;;  %v2673_v48 = vld [vmem:[#allocation6] ss:$0 sm:$0xff]  ;;  %v2691_v18 = vld [vmem:[#allocation6 + $0x8] ss:$0 sm:$0xff]  ;;  %v2695_v41 = vld [vmem:[#allocation6 + $0x4] ss:$0 sm:$0xff] }
  0xe4   : > { %v1296_v44 = vadd.f32 %v1280_v1, %v1242_v26  ;;  %v1031_v31 = vadd.f32 %v1015_v56, %v978_v63  ;;  %v963_v47 = vmul.f32 %v2154_v35, %v1258_v57  ;;  %v1227_v43 = vmul.f32 %v2174_v52, %v2585_v62  ;;  %v1586_v35 = vld [vmem:[%s2054_s19 + $0xc0] sm:$0xff]  ;;  %v1262_v26 = vld [vmem:[#allocation2 + $0x140] sm:$0xff] }
  0xe5   : > { %1607 = vst [vmem:[%s2246_s24 + $0x98] sm:$0xff] %v1401_v4  ;;  %v1190_v8 = vadd.f32 %v1174_v25, %v1137_v27  ;;  %v1281_v24 = vmul.f32 %v2176_v54, %v2621_v9  ;;  %v1122_v2 = vmul.f32 %v2166_v45, %v2594_v17  ;;  %v1016_v29 = vmul.f32 %v2647_v39, %v2578_v7  ;;  %v2658_v54 = vld [vmem:[#allocation2 + $0x138] sm:$0xff]  ;;  %v2662_v7 = vld [vmem:[#allocation6 + $0x2] ss:$0 sm:$0xff] }
  0xe6   : > { %v1349_v38 = vadd.f32 %v1333_v16, %v1296_v44  ;;  %v1084_v34 = vadd.f32 %v1068_v19, %v1031_v31  ;;  %v979_v42 = vadd.f32 %v963_v47, %v925_v37  ;;  %v1334_v58 = vmul.f32 %v2195_v28, %v2629_v51  ;;  %v2706_v19 = vld [vmem:[#allocation2 + $0x142] sm:$0xff]  ;;  %v2712_v37 = vld [vmem:[#allocation6 + $0x7] ss:$0 sm:$0xff] }
  0xe7   : > { %v1243_v57 = vadd.f32 %v1227_v43, %v1190_v8  ;;  %v1387_v52 = vmul.f32 %v2189_v21, %v2631_v30  ;;  %v1175_v45 = vmul.f32 %v2172_v50, %v2602_v10  ;;  %v1069_v5 = vmul.f32 %v2662_v7, %v2585_v62  ;;  %v2670_v50 = vld [vmem:[#allocation2 + $0x13a] sm:$0xff] }
  0xe8   : > { %v1402_v53 = vadd.f32 %v1386_v33, %v1349_v38  ;;  %v1138_v23 = vadd.f32 %v1122_v2, %v1084_v34  ;;  %v1032_v13 = vadd.f32 %v1016_v29, %v979_v42  ;;  %v1228_v21 = vmul.f32 %v2666_v32, %v2606_v11  ;;  %v2699_v33 = vld [vmem:[#allocation2 + $0x141] sm:$0xff]  ;;  %v1263_v38 = vld [vmem:[#allocation2 + $0x150] sm:$0xff] }
  0xe9   : > { %v1297_v12 = vadd.f32 %v1281_v24, %v1243_v57  ;;  %v926_v40 = vadd.f32 %v2636_v59, %v1586_v35  ;;  %v964_v46 = vmul.f32 %v2673_v48, %v2594_v17  ;;  %v1282_v62 = vmul.f32 %v2678_v49, %v2658_v54  ;;  %v1588_v43 = vld [vmem:[%s2054_s19 + $0xd0] sm:$0xff]  ;;  %v2725_v57 = vld [vmem:[#allocation2 + $0x151] sm:$0xff] }
  0xea   : > { %1608 = vst [vmem:[%s2246_s24 + $0xa0] sm:$0xff] %v1402_v53  ;;  %v1191_v60 = vadd.f32 %v1175_v45, %v1138_v23  ;;  %v1085_v55 = vadd.f32 %v1069_v5, %v1032_v13  ;;  %v1123_v0 = vmul.f32 %v2682_v22, %v2621_v9  ;;  %v1335_v36 = vmul.f32 %v2195_v28, %v2660_v14  ;;  %v2729_v53 = vld [vmem:[#allocation2 + $0x152] sm:$0xff] }
  0xeb   : > { %v1350_v61 = vadd.f32 %v1334_v58, %v1297_v12  ;;  %v980_v1 = vadd.f32 %v964_v46, %v926_v40  ;;  %v1017_v17 = vmul.f32 %v2647_v39, %v2602_v10  ;;  %v1388_v16 = vmul.f32 %v2691_v18, %v2670_v50 }
  0xec   : > { %v1244_v3 = vadd.f32 %v1228_v21, %v1191_v60  ;;  %v1139_v6 = vadd.f32 %v1123_v0, %v1085_v55  ;;  %v1176_v15 = vmul.f32 %v2695_v41, %v2629_v51  ;;  %v1070_v10 = vmul.f32 %v2662_v7, %v2606_v11 }
  0xed   : > { %v1403_v28 = vadd.f32 %v1387_v52, %v1350_v61  ;;  %v1033_v63 = vadd.f32 %v1017_v17, %v980_v1  ;;  %v927_v56 = vadd.f32 %v2636_v59, %v1587_v20  ;;  %v1229_v25 = vmul.f32 %v2666_v32, %v2631_v30  ;;  %v1264_v20 = vld [vmem:[#allocation2 + $0x158] sm:$0xff] }
  0xee   : > { %v1298_v4 = vadd.f32 %v1282_v62, %v1244_v3  ;;  %v1192_v27 = vadd.f32 %v1176_v15, %v1139_v6  ;;  %v965_v44 = vmul.f32 %v2673_v48, %v2621_v9  ;;  %v1283_v31 = vmul.f32 %v2678_v49, %v1262_v26  ;;  %v1589_v62 = vld [vmem:[%s2054_s19 + $0xd8] sm:$0xff]  ;;  %v2750_v6 = vld [vmem:[#allocation2 + $0x159] sm:$0xff] }
  0xef   : > { %1609 = vst [vmem:[%s2246_s24 + $0xa8] sm:$0xff] %v1403_v28  ;;  %v1336_v11 = vmul.f32 %v2712_v37, %v2699_v33  ;;  %v1086_v47 = vadd.f32 %v1070_v10, %v1033_v63  ;;  %v1124_v8 = vmul.f32 %v2682_v22, %v2658_v54  ;;  %v1018_v9 = vmul.f32 %v2647_v39, %v2629_v51  ;;  %v2752_v15 = vld [vmem:[#allocation2 + $0x15a] sm:$0xff] }
  0xf0   : > { %v1351_v24 = vadd.f32 %v1335_v36, %v1298_v4  ;;  %v1245_v2 = vadd.f32 %v1229_v25, %v1192_v27  ;;  %v981_v34 = vadd.f32 %v965_v44, %v927_v56  ;;  %v1389_v42 = vmul.f32 %v2691_v18, %v2706_v19 }
  0xf1   : > { %v1140_v29 = vadd.f32 %v1124_v8, %v1086_v47  ;;  %v1177_v35 = vmul.f32 %v2695_v41, %v2660_v14  ;;  %v1071_v58 = vmul.f32 %v2662_v7, %v2631_v30  ;;  %v928_v51 = vadd.f32 %v2636_v59, %v1588_v43 }
  0xf2   : > { %v1404_v52 = vadd.f32 %v1388_v16, %v1351_v24  ;;  %v1299_v45 = vadd.f32 %v1283_v31, %v1245_v2  ;;  %v1034_v23 = vadd.f32 %v1018_v9, %v981_v34  ;;  %v1230_v5 = vmul.f32 %v2666_v32, %v2670_v50  ;;  %v1265_v24 = vld [vmem:[#allocation2 + $0x168] sm:$0xff] }
  0xf3   : > { %v1193_v13 = vadd.f32 %v1177_v35, %v1140_v29  ;;  %v1284_v12 = vmul.f32 %v2678_v49, %v1263_v38  ;;  %v966_v21 = vmul.f32 %v2673_v48, %v2658_v54  ;;  %v1337_v30 = vmul.f32 %v2712_v37, %v2725_v57  ;;  %v2770_v9 = vld [vmem:[#allocation2 + $0x169] sm:$0xff] }
  0xf4   : > { %1610 = vst [vmem:[%s2246_s24 + $0xb0] sm:$0xff] %v1404_v52  ;;  %v1352_v40 = vadd.f32 %v1336_v11, %v1299_v45  ;;  %v1087_v46 = vadd.f32 %v1071_v58, %v1034_v23  ;;  %v1125_v60 = vmul.f32 %v2682_v22, %v1262_v26  ;;  %v1390_v0 = vmul.f32 %v2691_v18, %v2729_v53  ;;  %v1590_v11 = vld [vmem:[%s2054_s19 + $0xe0] sm:$0xff] }
  0xf5   : > { %v1246_v55 = vadd.f32 %v1230_v5, %v1193_v13  ;;  %v982_v61 = vadd.f32 %v966_v21, %v928_v51  ;;  %v1019_v36 = vmul.f32 %v2647_v39, %v2660_v14  ;;  %v1178_v17 = vmul.f32 %v2695_v41, %v2699_v33  ;;  %v2776_v58 = vld [vmem:[#allocation2 + $0x16a] sm:$0xff] }
  0xf6   : > { %v1405_v54 = vadd.f32 %v1389_v42, %v1352_v40  ;;  %v1141_v1 = vadd.f32 %v1125_v60, %v1087_v46  ;;  %v1072_v3 = vmul.f32 %v2662_v7, %v2670_v50  ;;  %v929_v63 = vadd.f32 %v2636_v59, %v1589_v62 }
  0xf7   : > { %v1300_v16 = vadd.f32 %v1284_v12, %v1246_v55  ;;  %v1035_v28 = vadd.f32 %v1019_v36, %v982_v61  ;;  %v967_v10 = vmul.f32 %v2673_v48, %v1262_v26  ;;  %v1231_v56 = vmul.f32 %v2666_v32, %v2706_v19  ;;  %v1591_v12 = vld [vmem:[%s2054_s19 + $0xe8] sm:$0xff]  ;;  %v1266_v55 = vld [vmem:[#allocation2 + $0x170] sm:$0xff] }
  0xf8   : > { %1611 = vst [vmem:[%s2246_s24 + $0xb8] sm:$0xff] %v1405_v54  ;;  %v1194_v14 = vadd.f32 %v1178_v17, %v1141_v1  ;;  %v1285_v4 = vmul.f32 %v2678_v49, %v1264_v20  ;;  %v1126_v50 = vmul.f32 %v2682_v22, %v1263_v38  ;;  %v1020_v31 = vmul.f32 %v2647_v39, %v2699_v33 }
  0xf9   : > { %v1353_v27 = vadd.f32 %v1337_v30, %v1300_v16  ;;  %v1088_v25 = vadd.f32 %v1072_v3, %v1035_v28  ;;  %v983_v44 = vadd.f32 %v967_v10, %v929_v63  ;;  %v1338_v26 = vmul.f32 %v2712_v37, %v2750_v6  ;;  %v1372_v16 = vld [vmem:[#allocation2 + $0x172] sm:$0xff] }
  0xfa   : > { %v1247_v47 = vadd.f32 %v1231_v56, %v1194_v14  ;;  %v1391_v8 = vmul.f32 %v2691_v18, %v2752_v15  ;;  %v1179_v43 = vmul.f32 %v2695_v41, %v2725_v57  ;;  %v1073_v33 = vmul.f32 %v2662_v7, %v2706_v19 }
  0xfb   : > { %v1406_v2 = vadd.f32 %v1390_v0, %v1353_v27  ;;  %v1142_v34 = vadd.f32 %v1126_v50, %v1088_v25  ;;  %v1036_v42 = vadd.f32 %v1020_v31, %v983_v44  ;;  %v1232_v35 = vmul.f32 %v2666_v32, %v2729_v53  ;;  %v1319_v0 = vld [vmem:[#allocation2 + $0x171] sm:$0xff]  ;;  %v1267_v27 = vld [vmem:[#allocation2 + $0x180] sm:$0xff] }
  0xfc   : > { %v1301_v29 = vadd.f32 %v1285_v4, %v1247_v47  ;;  %v930_v52 = vadd.f32 %v2636_v59, %v1590_v11  ;;  %v968_v45 = vmul.f32 %v2673_v48, %v1263_v38  ;;  %v1286_v51 = vmul.f32 %v2678_v49, %v1265_v24  ;;  %v1592_v4 = vld [vmem:[%s2054_s19 + $0xf0] sm:$0xff] }
  0xfd   : > { %1612 = vst [vmem:[%s2246_s24 + $0xc0] sm:$0xff] %v1406_v2  ;;  %v1195_v23 = vadd.f32 %v1179_v43, %v1142_v34  ;;  %v1089_v13 = vadd.f32 %v1073_v33, %v1036_v42  ;;  %v1127_v5 = vmul.f32 %v2682_v22, %v1264_v20  ;;  %v1339_v19 = vmul.f32 %v2712_v37, %v2770_v9  ;;  %v1320_v47 = vld [vmem:[#allocation2 + $0x181] sm:$0xff] }
  0xfe   : > { %v1354_v21 = vadd.f32 %v1338_v26, %v1301_v29  ;;  %v984_v40 = vadd.f32 %v968_v45, %v930_v52  ;;  %v1021_v30 = vmul.f32 %v2647_v39, %v2725_v57  ;;  %v1392_v38 = vmul.f32 %v2691_v18, %v2776_v58 }
  0xff   : > { %v1248_v46 = vadd.f32 %v1232_v35, %v1195_v23  ;;  %v1143_v60 = vadd.f32 %v1127_v5, %v1089_v13  ;;  %v1180_v62 = vmul.f32 %v2695_v41, %v2750_v6  ;;  %v1074_v54 = vmul.f32 %v2662_v7, %v2729_v53  ;;  %v1593_v23 = vld [vmem:[%s2054_s19 + $0xf8] sm:$0xff] }
 0x100   : > { %v1407_v61 = vadd.f32 %v1391_v8, %v1354_v21  ;;  %v1037_v36 = vadd.f32 %v1021_v30, %v984_v40  ;;  %v931_v1 = vadd.f32 %v2636_v59, %v1591_v12  ;;  %v1233_v3 = vmul.f32 %v2666_v32, %v2752_v15  ;;  %v1373_v13 = vld [vmem:[#allocation2 + $0x182] sm:$0xff] }
 0x101   : > { %v1302_v57 = vadd.f32 %v1286_v51, %v1248_v46  ;;  %v1196_v17 = vadd.f32 %v1180_v62, %v1143_v60  ;;  %v969_v28 = vmul.f32 %v2673_v48, %v1264_v20  ;;  %v1287_v63 = vmul.f32 %v2678_v49, %v1266_v55 }
 0x102   : > { %1613 = vst [vmem:[%s2246_s24 + $0xc8] sm:$0xff] %v1407_v61  ;;  %v1340_v10 = vmul.f32 %v2712_v37, %v1319_v0  ;;  %v1090_v14 = vadd.f32 %v1074_v54, %v1037_v36  ;;  %v1128_v56 = vmul.f32 %v2682_v22, %v1265_v24  ;;  %v1022_v44 = vmul.f32 %v2647_v39, %v2750_v6 }
 0x103   : > { %v1355_v53 = vadd.f32 %v1339_v19, %v1302_v57  ;;  %v1249_v50 = vadd.f32 %v1233_v3, %v1196_v17  ;;  %v985_v25 = vadd.f32 %v969_v28, %v931_v1  ;;  %v1393_v31 = vmul.f32 %v2691_v18, %v1372_v16  ;;  %v1321_v57 = vld [vmem:[#allocation2 + $0x189] sm:$0xff] }
 0x104   : > { %v1144_v20 = vadd.f32 %v1128_v56, %v1090_v14  ;;  %v1181_v11 = vmul.f32 %v2695_v41, %v2770_v9  ;;  %v1075_v26 = vmul.f32 %v2662_v7, %v2752_v15  ;;  %v932_v34 = vadd.f32 %v2636_v59, %v1592_v4 }
 0x105   : > { %v1408_v8 = vadd.f32 %v1392_v38, %v1355_v53  ;;  %v1303_v43 = vadd.f32 %v1287_v63, %v1249_v50  ;;  %v1038_v2 = vadd.f32 %v1022_v44, %v985_v25  ;;  %v1234_v6 = vmul.f32 %v2666_v32, %v2776_v58  ;;  %v1268_v38 = vld [vmem:[#allocation2 + $0x188] sm:$0xff] }
 0x106   : > { %v1197_v42 = vadd.f32 %v1181_v11, %v1144_v20  ;;  %v1288_v33 = vmul.f32 %v2678_v49, %v1267_v27  ;;  %v970_v29 = vmul.f32 %v2673_v48, %v1265_v24  ;;  %v1341_v52 = vmul.f32 %v2712_v37, %v1320_v47 }
 0x107   : > { %1614 = vst [vmem:[%s2246_s24 + $0xd0] sm:$0xff] %v1408_v8  ;;  %v1356_v35 = vadd.f32 %v1340_v10, %v1303_v43  ;;  %v1091_v45 = vadd.f32 %v1075_v26, %v1038_v2  ;;  %v1129_v15 = vmul.f32 %v2682_v22, %v1266_v55  ;;  %v1182_v5 = vmul.f32 %v2695_v41, %v1319_v0  ;;  %v1374_v10 = vld [vmem:[#allocation2 + $0x18a] sm:$0xff]  ;;  %v1375_v8 = vld [vmem:[#allocation2 + $0x19a] sm:$0xff] }
 0x108   : > { %v1250_v51 = vadd.f32 %v1234_v6, %v1197_v42  ;;  %v986_v12 = vadd.f32 %v970_v29, %v932_v34  ;;  %v1023_v21 = vmul.f32 %v2647_v39, %v2770_v9  ;;  %v1076_v24 = vmul.f32 %v2662_v7, %v2776_v58  ;;  %v1323_v43 = vld [vmem:[#allocation2 + $0x1a1] sm:$0xff] }
 0x109   : > { %v1409_v19 = vadd.f32 %v1393_v31, %v1356_v35  ;;  %v1145_v40 = vadd.f32 %v1129_v15, %v1091_v45  ;;  %v1130_v30 = vmul.f32 %v2682_v22, %v1267_v27  ;;  %v933_v62 = vadd.f32 %v2636_v59, %v1593_v23  ;;  %v1322_v27 = vld [vmem:[#allocation2 + $0x199] sm:$0xff] }
 0x10a   : > { %v1304_v46 = vadd.f32 %v1288_v33, %v1250_v51  ;;  %v1039_v60 = vadd.f32 %v1023_v21, %v986_v12  ;;  %v971_v61 = vmul.f32 %v2673_v48, %v1266_v55  ;;  %v1394_v36 = vmul.f32 %v2691_v18, %v1373_v13 }
 0x10b   : > { %1615 = vst [vmem:[%s2246_s24 + $0xd8] sm:$0xff] %v1409_v19  ;;  %v1198_v54 = vadd.f32 %v1182_v5, %v1145_v40  ;;  %v1235_v9 = vmul.f32 %v2666_v32, %v1372_v16  ;;  %v1024_v3 = vmul.f32 %v2647_v39, %v1319_v0  ;;  %v1289_v63 = vmul.f32 %v2678_v49, %v1268_v38  ;;  %v1715_v0 = vld [vmem:[#allocation2] sm:$0xff] }
 0x10c   : > { %v1357_v1 = vadd.f32 %v1341_v52, %v1304_v46  ;;  %v1092_v17 = vadd.f32 %v1076_v24, %v1039_v60  ;;  %v987_v58 = vadd.f32 %v971_v61, %v933_v62  ;;  %v1183_v59 = vmul.f32 %v2695_v41, %v1320_v47 }
 0x10d   : > { %v1251_v28 = vadd.f32 %v1235_v9, %v1198_v54  ;;  %v1077_v48 = vmul.f32 %v2662_v7, %v1372_v16  ;;  %v1131_v4 = vmul.f32 %v2682_v22, %v1268_v38  ;;  %v1342_v50 = vmul.f32 %v2712_v37, %v1321_v57 }
 0x10e   : > { %v1410_v55 = vadd.f32 %v1394_v36, %v1357_v1  ;;  %v1146_v14 = vadd.f32 %v1130_v30, %v1092_v17  ;;  %v1040_v56 = vadd.f32 %v1024_v3, %v987_v58  ;;  %v1236_v39 = vmul.f32 %v2666_v32, %v1373_v13 }
 0x10f   : > { %v1305_v53 = vadd.f32 %v1289_v63, %v1251_v28  ;;  %v1290_v44 = vmul.f32 %v1715_v0, %v2678_v49  ;;  %v1395_v16 = vmul.f32 %v2691_v18, %v1374_v10  ;;  %v1343_v11 = vmul.f32 %v2712_v37, %v1322_v27 }
 0x110   : > { %1616 = vst [vmem:[%s2246_s24 + $0xe0] sm:$0xff] %v1410_v55  ;;  %v1199_v25 = vadd.f32 %v1183_v59, %v1146_v14  ;;  %v1093_v31 = vadd.f32 %v1077_v48, %v1040_v56  ;;  %v1184_v47 = vmul.f32 %v2695_v41, %v1321_v57  ;;  %v1237_v49 = vmul.f32 %v2666_v32, %v1374_v10  ;;  %v1376_v41 = vld [vmem:[#allocation2 + $0x1a2] sm:$0xff] }
 0x111   : > { %v1358_v7 = vadd.f32 %v1342_v50, %v1305_v53  ;;  %v1396_v6 = vmul.f32 %v2691_v18, %v1375_v8  ;;  %v1344_v29 = vmul.f32 %v2712_v37, %v1323_v43  ;;  %v1397_v15 = vmul.f32 %v2691_v18, %v1376_v41 }
 0x112   : > { %v1252_v20 = vadd.f32 %v1236_v39, %v1199_v25  ;;  %v1147_v22 = vadd.f32 %v1131_v4, %v1093_v31 }
 0x113   : > { %v1411_v26 = vadd.f32 %v1395_v16, %v1358_v7 }
 0x114   : > { %v1306_v2 = vadd.f32 %v1290_v44, %v1252_v20  ;;  %v1200_v34 = vadd.f32 %v1184_v47, %v1147_v22 }
 0x115   : > { %1617 = vst [vmem:[%s2246_s24 + $0xe8] sm:$0xff] %v1411_v26 }
 0x116   : > { %v1359_v42 = vadd.f32 %v1343_v11, %v1306_v2  ;;  %v1253_v33 = vadd.f32 %v1237_v49, %v1200_v34 }
 0x118   : > { %v1412_v35 = vadd.f32 %v1396_v6, %v1359_v42  ;;  %v1307_v52 = vadd.f32 %v1290_v44, %v1253_v33 }
 0x11a   : > { %1618 = vst [vmem:[%s2246_s24 + $0xf0] sm:$0xff] %v1412_v35  ;;  %v1360_v45 = vadd.f32 %v1344_v29, %v1307_v52 }
 0x11c   : > { %v1413_v32 = vadd.f32 %v1397_v15, %v1360_v45 }
 0x11e   : > { %1619 = vst [vmem:[%s2246_s24 + $0xf8] sm:$0xff] %v1413_v32 }
 0x11f   : > { %1787 = shalt.err (!%p1784_p5)
}
 0x120   : > { %s1788_s7 = scalar_lea.hbm %s2853_s26, 4096  ;;  %s1792_s22 = scalar_lea.hbm %s2908_s3, 8192 }
 0x121   : > { %p1789_p9 = scmp.ne.s32.totalorder %s2853_s26, %s1788_s7  ;;  %p1793_p3 = scmp.lt.u32.totalorder %s2853_s26, %s2908_s3 }
 0x122   : > { %p1794_p7 = scmp.lt.u32.totalorder %s1792_s22, %s1788_s7  ;;  %p1796_p4 = scmp.lt.u32.totalorder %s1788_s7, %s2853_s26 }
 0x123   : > { %p1790_p1 = pnand %p1789_p9, %p1989_p10 }
 0x124   : > { %p1795_p13 = por %p1794_p7, %p1793_p3 }
 0x125   : > { %p1791_p2 = pneg %p1790_p1 }
 0x126   : > { %p1797_p6 = por %p1796_p4, %p1795_p13 }
 0x128   : > { %p1798_p8 = pnand %p1797_p6, %p1791_p2 }
 0x12a   : > { %1801 = shalt.err (!%p1798_p8)
}
 0x12b   : > { %s1868_s11 = smov 128   ;;  %s1869_s9 = smov 8  }
 0x12c   : > { %1633 = dma.vmem_to_hbm [thread:$0]  (%p1989_p10), %s2855_s18, 4096, %s2853_s26, %s1432_s21, %s1868_s11, %s1868_s11, %s1869_s9  }
 0x12d PF: > { %s1461_s25 = sand.u32 1, %s1840_s12   ;;  %p2926_p12 = scmp.ne.s32.totalorder %s2916_s23, 0 }
 0x12e   : > { %p2927_p11 = scmp.ge.s32.totalorder %s1860_s17, 2  ;;  %s1462_s8 = scalar_lea.sflag [#allocation5], %s1461_s25 }
 0x130   : > { %p1644_p0 = pnand %p2927_p11, %p2926_p12 }
 0x132   : > { %1835 = dma.done.wait (!%p1644_p0), %s1462_s8, 4096  }
 0x133   : > { %1837 = vsyncadd (!%p1644_p0), %s1462_s8, 4294963200  ;;  %s20_s17 = sadd.s32 1, %s1860_s17   ;;  %s2928_s12 = smov %s1844_s13 }
 0x134   : > { %p17_p5 = scmp.ge.s32.totalorder %s20_s17, 4   ;;  %s2929_s13 = smov %s1848_s14 }
 0x135   : > { %s2930_s14 = smov %s1998_s5  ;;  %s2931_s15 = smov %s1856_s16 }
 0x136   : > { %s2932_s16 = smov %s2934_s28  ;;  %19 = sbr.rel (!%p17_p5) target bundleno = 7 (0x7), region = 92 }
 0x13d   :  { %1467 = vsyncpa [#allocation4], 1 }
 0x13e   :  { %1469 = vsyncpa [#allocation4 + $0x1], 1 }
 0x13f   :  { %1470 = vsyncpa [#allocation7], 1 }
 0x140   :  { %1471 = vsyncpa [#allocation5], 1 }
 0x141   :  { %1473 = vsyncpa [#allocation5 + $0x1], 1 }

</bundles_post_ra>
